<compile_context>
chip_gen: v5e
topology: v5e:2x2
jax: 0.10.0
libtpu: 0.0.40
codegen_flags: <defaults>
</compile_context>

<pallas_src>
import functools

import jax
import jax.numpy as jnp
from jax import lax
from jax.experimental import pallas as pl
from jax.experimental.pallas import tpu as pltpu


def _round_up(x, m):
    return ((x + m - 1) // m) * m


def _choose_block(B, block_b):
    # Aim for >= ~4 grid steps (so v7x's two TCs each get >= 2 blocks), cap at block_b,
    # keep bb a multiple of 128 when large (v5e MXU friendly) else a multiple of 8 (sublane).
    target = -(-B // 4)  # cdiv(B, 4)
    bb = _round_up(target, 128) if target >= 128 else _round_up(max(target, 8), 8)
    return max(8, min(block_b, bb))


def _proj_head_kernel(x_ref, w1_ref, b1_ref, w2_ref, b2_ref, w3_ref, b3_ref,
                      gamma_ref, beta_ref, o_ref, *, approximate_gelu):
    cdt = w1_ref.dtype                      # matmul operand dtype (bf16 fast path / f32)
    x = x_ref[...].astype(cdt)              # cast in-kernel: no wrapper astype HBM pass

    # Hoist broadcast-able params once (JAX does not CSE broadcast_in_dim).
    b1 = b1_ref[...]
    b2 = b2_ref[...]
    b3 = b3_ref[...]
    gamma = gamma_ref[...]
    beta = beta_ref[...]

    # --- Linear 1 (MXU, f32 accumulate) + GELU ---
    h = jnp.dot(x, w1_ref[...], preferred_element_type=jnp.float32) + b1
    if approximate_gelu:
        # tanh GELU -> EUP (separate VLIW slot, overlaps MXU); default fast path.
        h = jax.nn.gelu(h, approximate=True)
    else:
        # exact erf GELU (nn.GELU() default) for tight f32 verification.
        h = 0.5 * h * (1.0 + lax.erf(h * 0.7071067811865475))
    # Dropout(p=0.1) is identity in eval mode.
    # TODO(synk): training-mode dropout (pltpu.prng_seed / prng_random_bits mask) not implemented.

    # --- Linear 2 + ReLU ---
    h = jnp.dot(h.astype(cdt), w2_ref[...], preferred_element_type=jnp.float32) + b2
    h = jnp.maximum(h, 0.0)

    # --- Linear 3 ---
    y = jnp.dot(h.astype(cdt), w3_ref[...], preferred_element_type=jnp.float32) + b3

    # --- LayerNorm over last dim, f32 (eps matches nn.LayerNorm default 1e-5) ---
    mean = jnp.mean(y, axis=-1, keepdims=True)
    var = jnp.mean((y - mean) * (y - mean), axis=-1, keepdims=True)
    y = (y - mean) * lax.rsqrt(var + 1e-5)
    o_ref[...] = (y * gamma + beta).astype(o_ref.dtype)


def prepare_projection_params(w1, b1, w2, b2, w3, b3, gamma, beta,
                              compute_dtype=jnp.bfloat16):
    """One-time (outside the jitted call) cast/reshape so the per-call wrapper does
    no extra HBM passes.  Weights: [in, out] in compute_dtype; biases / LN params
    stay f32, reshaped to (1, N) for lane-dense broadcast inside the kernel."""
    return dict(
        w1=w1.astype(compute_dtype),
        w2=w2.astype(compute_dtype),
        w3=w3.astype(compute_dtype),
        b1=b1.reshape(1, -1).astype(jnp.float32),
        b2=b2.reshape(1, -1).astype(jnp.float32),
        b3=b3.reshape(1, -1).astype(jnp.float32),
        gamma=gamma.reshape(1, -1).astype(jnp.float32),
        beta=beta.reshape(1, -1).astype(jnp.float32),
    )


@functools.partial(jax.jit, static_argnames=("block_b", "approximate_gelu"))
def projection_head(x, params, *, block_b=512, approximate_gelu=True):
    B, d_in = x.shape
    w1, w2, w3 = params["w1"], params["w2"], params["w3"]
    hidden = w1.shape[1]
    d_out = w3.shape[1]
    out_dtype = x.dtype

    bb = _choose_block(B, block_b)
    grid = (pl.cdiv(B, bb),)      # ragged tail handled by Pallas masked stores (no pad/slice)

    full = lambda shape: pl.BlockSpec(shape, lambda i: (0, 0))

    cd_bytes = jnp.dtype(w1.dtype).itemsize
    x_bytes = jnp.dtype(x.dtype).itemsize
    o_bytes = jnp.dtype(out_dtype).itemsize
    # Weights + params double-buffered (constant-index blocks; TODO(synk): switch them to
    # pipeline_mode=pl.Buffered(1) once dims grow near v7x's 64 MiB/TC VMEM),
    # x/out streaming blocks double-buffered, ~4 live f32 intermediates for the larger block.
    w_bytes = (d_in * hidden + hidden * hidden + hidden * d_out) * cd_bytes * 2
    p_bytes = (2 * hidden + 3 * d_out) * 4 * 2
    io_bytes = bb * d_in * x_bytes * 2 + bb * d_out * o_bytes * 2
    tmp_bytes = 4 * bb * max(hidden, d_out) * 4
    vmem_bytes = int(min(max(int(1.25 * (w_bytes + p_bytes + io_bytes + tmp_bytes)),
                             8 << 20), 48 << 20))
    # TODO(synk): if d_in/hidden grow past the VMEM budget, add a K-tiling grid axis with a
    # pl.when-guarded f32 accumulator instead of keeping the weights fully resident.

    flops = 2 * B * (d_in * hidden + hidden * hidden + hidden * d_out)
    bytes_accessed = (B * d_in * x_bytes
                      + (w1.size + w2.size + w3.size) * cd_bytes
                      + (2 * hidden + 3 * d_out) * 4
                      + B * d_out * o_bytes)

    kernel = functools.partial(_proj_head_kernel, approximate_gelu=approximate_gelu)
    return pl.pallas_call(
        kernel,
        out_shape=jax.ShapeDtypeStruct((B, d_out), out_dtype),
        grid=grid,
        in_specs=[
            pl.BlockSpec((bb, d_in), lambda i: (i, 0)),   # x rows (streamed)
            full((d_in, hidden)),                         # W1 (resident)
            full((1, hidden)),                            # b1
            full((hidden, hidden)),                       # W2
            full((1, hidden)),                            # b2
            full((hidden, d_out)),                        # W3
            full((1, d_out)),                             # b3
            full((1, d_out)),                             # gamma
            full((1, d_out)),                             # beta
        ],
        out_specs=pl.BlockSpec((bb, d_out), lambda i: (i, 0)),
        compiler_params=pltpu.CompilerParams(
            dimension_semantics=("parallel",),
            vmem_limit_bytes=vmem_bytes),
        cost_estimate=pl.CostEstimate(
            flops=flops,
            transcendentals=B * hidden + B,
            bytes_accessed=bytes_accessed),
    )(x, w1, params["b1"], w2, params["b2"], w3, params["b3"],
      params["gamma"], params["beta"])


def _reference(x, w1, b1, w2, b2, w3, b3, gamma, beta):
    h = x @ w1 + b1
    h = 0.5 * h * (1.0 + lax.erf(h / jnp.sqrt(2.0)))
    h = jnp.maximum(h @ w2 + b2, 0.0)
    y = h @ w3 + b3
    mean = y.mean(-1, keepdims=True)
    var = ((y - mean) ** 2).mean(-1, keepdims=True)
    return (y - mean) / jnp.sqrt(var + 1e-5) * gamma + beta


if __name__ == "__main__":
    # Small batch; feature dims are the module defaults (512 -> 512 -> 128), lane-dense (x128).
    B, D_IN, HID, D_OUT = 16, 512, 512, 128

    key = jax.random.PRNGKey(0)
    ks = jax.random.split(key, 8)
    x = jax.random.normal(ks[0], (B, D_IN), dtype=jnp.float32)
    w1 = jax.random.normal(ks[1], (D_IN, HID), dtype=jnp.float32) * 0.05
    b1 = jax.random.normal(ks[2], (HID,), dtype=jnp.float32) * 0.05
    w2 = jax.random.normal(ks[3], (HID, HID), dtype=jnp.float32) * 0.05
    b2 = jax.random.normal(ks[4], (HID,), dtype=jnp.float32) * 0.05
    w3 = jax.random.normal(ks[5], (HID, D_OUT), dtype=jnp.float32) * 0.05
    b3 = jax.random.normal(ks[6], (D_OUT,), dtype=jnp.float32) * 0.05
    gamma = jnp.ones((D_OUT,), dtype=jnp.float32)
    beta = jnp.zeros((D_OUT,), dtype=jnp.float32)

    ref = _reference(x, w1, b1, w2, b2, w3, b3, gamma, beta)

    # Exact-semantics check: f32 compute path + exact erf GELU must match tightly.
    params_f32 = prepare_projection_params(w1, b1, w2, b2, w3, b3, gamma, beta,
                                           compute_dtype=jnp.float32)
    out_f32 = jax.block_until_ready(
        projection_head(x, params_f32, approximate_gelu=False))
    assert out_f32.shape == (B, D_OUT)
    assert jnp.allclose(out_f32, ref, atol=1e-5, rtol=1e-5)

    # Default fast path: bf16 matmul operands, tanh GELU, f32 accumulation / epilogue.
    params_bf16 = prepare_projection_params(w1, b1, w2, b2, w3, b3, gamma, beta)
    out_bf16 = jax.block_until_ready(projection_head(x, params_bf16))
    assert out_bf16.shape == (B, D_OUT)
    assert jnp.allclose(out_bf16, ref, atol=1e-1, rtol=1e-1)

    # Ragged batch (not a multiple of the row block): exercises the cdiv grid / masked
    # tail-store path that replaced the wrapper pad + slice.
    B2 = 100
    x2 = jax.random.normal(ks[7], (B2, D_IN), dtype=jnp.float32)
    ref2 = _reference(x2, w1, b1, w2, b2, w3, b3, gamma, beta)
    out2 = jax.block_until_ready(
        projection_head(x2, params_f32, approximate_gelu=False))
    assert out2.shape == (B2, D_OUT)
    assert jnp.allclose(out2, ref2, atol=1e-5, rtol=1e-5)

    print("KERNEL_OK")
</pallas_src>

<mosaic_0001>
module attributes {stable_mosaic.version = 11 : i64} {
  func.func @_proj_head_kernel(%arg0: i32, %arg1: memref<8x512xf32, #tpu.memory_space<vmem>>, %arg2: memref<512x512xf32, #tpu.memory_space<vmem>>, %arg3: memref<1x512xf32, #tpu.memory_space<vmem>>, %arg4: memref<512x512xf32, #tpu.memory_space<vmem>>, %arg5: memref<1x512xf32, #tpu.memory_space<vmem>>, %arg6: memref<512x128xf32, #tpu.memory_space<vmem>>, %arg7: memref<1x128xf32, #tpu.memory_space<vmem>>, %arg8: memref<1x128xf32, #tpu.memory_space<vmem>>, %arg9: memref<1x128xf32, #tpu.memory_space<vmem>>, %arg10: memref<8x128xf32, #tpu.memory_space<vmem>>) attributes {dimension_semantics = [#tpu.dimension_semantics<parallel>], iteration_bounds = array<i64: 2>, scalar_prefetch = 0 : i64, scratch_operands = 0 : i64, tpu.core_type = #tpu.core_type<tc>, window_params = [{transform_indices = @transform_0, window_bounds = array<i64: 8, 512>}, {pipeline_mode = #tpu.pipeline_mode<synchronous>, transform_indices = @transform_1, window_bounds = array<i64: 512, 512>}, {pipeline_mode = #tpu.pipeline_mode<synchronous>, transform_indices = @transform_2, window_bounds = array<i64: 1, 512>}, {pipeline_mode = #tpu.pipeline_mode<synchronous>, transform_indices = @transform_3, window_bounds = array<i64: 512, 512>}, {pipeline_mode = #tpu.pipeline_mode<synchronous>, transform_indices = @transform_4, window_bounds = array<i64: 1, 512>}, {pipeline_mode = #tpu.pipeline_mode<synchronous>, transform_indices = @transform_5, window_bounds = array<i64: 512, 128>}, {pipeline_mode = #tpu.pipeline_mode<synchronous>, transform_indices = @transform_6, window_bounds = array<i64: 1, 128>}, {pipeline_mode = #tpu.pipeline_mode<synchronous>, transform_indices = @transform_7, window_bounds = array<i64: 1, 128>}, {pipeline_mode = #tpu.pipeline_mode<synchronous>, transform_indices = @transform_8, window_bounds = array<i64: 1, 128>}, {transform_indices = @transform_9, window_bounds = array<i64: 8, 128>}]} {
    %c0 = arith.constant 0 : index
    %c0_0 = arith.constant 0 : index
    %0 = vector.load %arg1[%c0, %c0_0] : memref<8x512xf32, #tpu.memory_space<vmem>>, vector<8x512xf32>
    %c0_1 = arith.constant 0 : index
    %c0_2 = arith.constant 0 : index
    %1 = vector.load %arg3[%c0_1, %c0_2] : memref<1x512xf32, #tpu.memory_space<vmem>>, vector<1x512xf32>
    %c0_3 = arith.constant 0 : index
    %c0_4 = arith.constant 0 : index
    %2 = vector.load %arg5[%c0_3, %c0_4] : memref<1x512xf32, #tpu.memory_space<vmem>>, vector<1x512xf32>
    %c0_5 = arith.constant 0 : index
    %c0_6 = arith.constant 0 : index
    %3 = vector.load %arg7[%c0_5, %c0_6] : memref<1x128xf32, #tpu.memory_space<vmem>>, vector<1x128xf32>
    %c0_7 = arith.constant 0 : index
    %c0_8 = arith.constant 0 : index
    %4 = vector.load %arg8[%c0_7, %c0_8] : memref<1x128xf32, #tpu.memory_space<vmem>>, vector<1x128xf32>
    %c0_9 = arith.constant 0 : index
    %c0_10 = arith.constant 0 : index
    %5 = vector.load %arg9[%c0_9, %c0_10] : memref<1x128xf32, #tpu.memory_space<vmem>>, vector<1x128xf32>
    %c0_11 = arith.constant 0 : index
    %c0_12 = arith.constant 0 : index
    %6 = vector.load %arg2[%c0_11, %c0_12] : memref<512x512xf32, #tpu.memory_space<vmem>>, vector<512x512xf32>
    %cst = arith.constant dense<0.000000e+00> : vector<8x512xf32>
    %7 = tpu.matmul %0, %6, %cst {dimension_numbers = #tpu.dot_dimension_numbers<[1], [0], [0], [1], [0, 0, 1, 1], [], []>} : vector<8x512xf32>, vector<512x512xf32>, vector<8x512xf32> -> vector<8x512xf32>
    %8 = vector.broadcast %1 : vector<1x512xf32> to vector<8x512xf32>
    %9 = arith.addf %7, %8 : vector<8x512xf32>
    %cst_13 = arith.constant 5.000000e-01 : f32
    %10 = vector.broadcast %cst_13 : f32 to vector<8x512xf32>
    %11 = arith.mulf %10, %9 : vector<8x512xf32>
    %cst_14 = arith.constant 0.707106769 : f32
    %12 = vector.broadcast %cst_14 : f32 to vector<8x512xf32>
    %13 = arith.mulf %9, %12 : vector<8x512xf32>
    %14 = math.erf %13 : vector<8x512xf32>
    %cst_15 = arith.constant 1.000000e+00 : f32
    %15 = vector.broadcast %cst_15 : f32 to vector<8x512xf32>
    %16 = arith.addf %15, %14 : vector<8x512xf32>
    %17 = arith.mulf %11, %16 : vector<8x512xf32>
    %c0_16 = arith.constant 0 : index
    %c0_17 = arith.constant 0 : index
    %18 = vector.load %arg4[%c0_16, %c0_17] : memref<512x512xf32, #tpu.memory_space<vmem>>, vector<512x512xf32>
    %cst_18 = arith.constant dense<0.000000e+00> : vector<8x512xf32>
    %19 = tpu.matmul %17, %18, %cst_18 {dimension_numbers = #tpu.dot_dimension_numbers<[1], [0], [0], [1], [0, 0, 1, 1], [], []>} : vector<8x512xf32>, vector<512x512xf32>, vector<8x512xf32> -> vector<8x512xf32>
    %20 = vector.broadcast %2 : vector<1x512xf32> to vector<8x512xf32>
    %21 = arith.addf %19, %20 : vector<8x512xf32>
    %cst_19 = arith.constant 0.000000e+00 : f32
    %22 = vector.broadcast %cst_19 : f32 to vector<8x512xf32>
    %23 = arith.maximumf %21, %22 : vector<8x512xf32>
    %c0_20 = arith.constant 0 : index
    %c0_21 = arith.constant 0 : index
    %24 = vector.load %arg6[%c0_20, %c0_21] : memref<512x128xf32, #tpu.memory_space<vmem>>, vector<512x128xf32>
    %cst_22 = arith.constant dense<0.000000e+00> : vector<8x128xf32>
    %25 = tpu.matmul %23, %24, %cst_22 {dimension_numbers = #tpu.dot_dimension_numbers<[1], [0], [0], [1], [0, 0, 1, 1], [], []>} : vector<8x512xf32>, vector<512x128xf32>, vector<8x128xf32> -> vector<8x128xf32>
    %26 = vector.broadcast %3 : vector<1x128xf32> to vector<8x128xf32>
    %27 = arith.addf %25, %26 : vector<8x128xf32>
    %cst_23 = arith.constant dense<0.000000e+00> : vector<8xf32>
    %28 = vector.multi_reduction <add>, %27, %cst_23 [1] : vector<8x128xf32> to vector<8xf32>
    %29 = vector.shape_cast %28 : vector<8xf32> to vector<8x1xf32>
    %cst_24 = arith.constant 1.280000e+02 : f32
    %30 = vector.broadcast %cst_24 : f32 to vector<8x1xf32>
    %31 = arith.divf %29, %30 : vector<8x1xf32>
    %32 = vector.broadcast %31 : vector<8x1xf32> to vector<8x128xf32>
    %33 = arith.subf %27, %32 : vector<8x128xf32>
    %34 = vector.broadcast %31 : vector<8x1xf32> to vector<8x128xf32>
    %35 = arith.subf %27, %34 : vector<8x128xf32>
    %36 = arith.mulf %33, %35 : vector<8x128xf32>
    %cst_25 = arith.constant dense<0.000000e+00> : vector<8xf32>
    %37 = vector.multi_reduction <add>, %36, %cst_25 [1] : vector<8x128xf32> to vector<8xf32>
    %38 = vector.shape_cast %37 : vector<8xf32> to vector<8x1xf32>
    %cst_26 = arith.constant 1.280000e+02 : f32
    %39 = vector.broadcast %cst_26 : f32 to vector<8x1xf32>
    %40 = arith.divf %38, %39 : vector<8x1xf32>
    %41 = vector.broadcast %31 : vector<8x1xf32> to vector<8x128xf32>
    %42 = arith.subf %27, %41 : vector<8x128xf32>
    %cst_27 = arith.constant 9.99999974E-6 : f32
    %43 = vector.broadcast %cst_27 : f32 to vector<8x1xf32>
    %44 = arith.addf %40, %43 : vector<8x1xf32>
    %45 = math.rsqrt %44 : vector<8x1xf32>
    %46 = vector.broadcast %45 : vector<8x1xf32> to vector<8x128xf32>
    %47 = arith.mulf %42, %46 : vector<8x128xf32>
    %48 = vector.broadcast %4 : vector<1x128xf32> to vector<8x128xf32>
    %49 = arith.mulf %47, %48 : vector<8x128xf32>
    %50 = vector.broadcast %5 : vector<1x128xf32> to vector<8x128xf32>
    %51 = arith.addf %49, %50 : vector<8x128xf32>
    %c0_28 = arith.constant 0 : index
    %c0_29 = arith.constant 0 : index
    %52 = vector.load %arg10[%c0_28, %c0_29] : memref<8x128xf32, #tpu.memory_space<vmem>>, vector<8x128xf32>
    tpu.vector_store %arg10[%c0_28, %c0_29], %51 {strides = array<i32>} : memref<8x128xf32, #tpu.memory_space<vmem>>, vector<8x128xf32>,
    return
  }
  func.func @transform_0(%arg0: i32) -> (i32, i32) {
    %c0_i32 = arith.constant 0 : i32
    %c0_i32_0 = arith.constant 0 : i32
    return %arg0, %c0_i32 : i32, i32
  }
  func.func @transform_1(%arg0: i32) -> (i32, i32) {
    %c0_i32 = arith.constant 0 : i32
    %c0_i32_0 = arith.constant 0 : i32
    %c0_i32_1 = arith.constant 0 : i32
    return %c0_i32, %c0_i32_0 : i32, i32
  }
  func.func @transform_2(%arg0: i32) -> (i32, i32) {
    %c0_i32 = arith.constant 0 : i32
    %c0_i32_0 = arith.constant 0 : i32
    %c0_i32_1 = arith.constant 0 : i32
    return %c0_i32, %c0_i32_0 : i32, i32
  }
  func.func @transform_3(%arg0: i32) -> (i32, i32) {
    %c0_i32 = arith.constant 0 : i32
    %c0_i32_0 = arith.constant 0 : i32
    %c0_i32_1 = arith.constant 0 : i32
    return %c0_i32, %c0_i32_0 : i32, i32
  }
  func.func @transform_4(%arg0: i32) -> (i32, i32) {
    %c0_i32 = arith.constant 0 : i32
    %c0_i32_0 = arith.constant 0 : i32
    %c0_i32_1 = arith.constant 0 : i32
    return %c0_i32, %c0_i32_0 : i32, i32
  }
  func.func @transform_5(%arg0: i32) -> (i32, i32) {
    %c0_i32 = arith.constant 0 : i32
    %c0_i32_0 = arith.constant 0 : i32
    %c0_i32_1 = arith.constant 0 : i32
    return %c0_i32, %c0_i32_0 : i32, i32
  }
  func.func @transform_6(%arg0: i32) -> (i32, i32) {
    %c0_i32 = arith.constant 0 : i32
    %c0_i32_0 = arith.constant 0 : i32
    %c0_i32_1 = arith.constant 0 : i32
    return %c0_i32, %c0_i32_0 : i32, i32
  }
  func.func @transform_7(%arg0: i32) -> (i32, i32) {
    %c0_i32 = arith.constant 0 : i32
    %c0_i32_0 = arith.constant 0 : i32
    %c0_i32_1 = arith.constant 0 : i32
    return %c0_i32, %c0_i32_0 : i32, i32
  }
  func.func @transform_8(%arg0: i32) -> (i32, i32) {
    %c0_i32 = arith.constant 0 : i32
    %c0_i32_0 = arith.constant 0 : i32
    %c0_i32_1 = arith.constant 0 : i32
    return %c0_i32, %c0_i32_0 : i32, i32
  }
  func.func @transform_9(%arg0: i32) -> (i32, i32) {
    %c0_i32 = arith.constant 0 : i32
    %c0_i32_0 = arith.constant 0 : i32
    return %arg0, %c0_i32 : i32, i32
  }
}

</mosaic_0001>

<bundles_post_ra>
// kernel: projection_head.1
= control target key start
LH: loop header
LB: loop body
LE: loop exit
PB: predicated region body
PF: predicated region fallthrough
CT: control target
= control target key end

     0   :  { %s2932_s0 = inlined_call_operand.hbm [shape: f32[16,512], index: 0, kind: input, shape index: {}]   ;;  %s2933_s1 = inlined_call_operand.hbm [shape: f32[512,512], index: 1, kind: input, shape index: {}]   ;;  %s2934_s2 = inlined_call_operand.hbm [shape: f32[1,512], index: 2, kind: input, shape index: {}]   ;;  %s2935_s3 = inlined_call_operand.hbm [shape: f32[512,512], index: 3, kind: input, shape index: {}]   ;;  %s2936_s4 = inlined_call_operand.hbm [shape: f32[1,512], index: 4, kind: input, shape index: {}]   ;;  %s2937_s5 = inlined_call_operand.hbm [shape: f32[512,128], index: 5, kind: input, shape index: {}]   ;;  %s2938_s6 = inlined_call_operand.vmem [shape: f32[1,128], index: 6, kind: input, shape index: {}]   ;;  %s2939_s7 = inlined_call_operand.vmem [shape: f32[1,128], index: 7, kind: input, shape index: {}]   ;;  %s2940_s8 = inlined_call_operand.vmem [shape: f32[1,128], index: 8, kind: input, shape index: {}]   ;;  %s2941_s9 = inlined_call_operand.hbm [shape: f32[16,128], index: 9, kind: output, shape index: {}]  }
   0x1   :  { %2942 = sst [smem:[#allocation19_spill]] %s2933_s1 }
   0x2   :  { %2943 = sst [smem:[#allocation20_spill]] %s2934_s2 }
   0x3   :  { %2944 = sst [smem:[#allocation21_spill]] %s2935_s3 }
   0x4   :  { %14 = vsyncpa [#allocation3], 0 }
   0x5   :  { %16 = vsyncpa [#allocation3 + $0x1], 0 }
   0x6   :  { %17 = vsyncpa [#allocation6], 0 }
   0x7   :  { %18 = vsyncpa [#allocation9], 0 }
   0x8   :  { %19 = vsyncpa [#allocation12], 0 }
   0x9   :  { %20 = vsyncpa [#allocation4], 0 }
   0xa   :  { %22 = vsyncpa [#allocation4 + $0x1], 0  ;;  %s2571_s30 = smov 0   ;;  %s2573_s10 = smov 0  }
   0xb   :  { %s2575_s11 = smov 0   ;;  %s2577_s12 = smov 0  }
   0xc LB: > { %s2945_s1 = sld [smem:[#allocation19_spill]]  ;;  %s2595_s16 = sadd.s32 4294967295, %s2509_s12   ;;  %s2509_s12 = sphi %s2577_s12, %s2962_s12   ;;  %s2505_s11 = sphi %s2575_s11, %s2961_s11   ;;  %s2501_s10 = sphi %s2573_s10, %s2960_s10   ;;  %s2497_s30 = sphi %s2571_s30, %s2959_s30  }
   0xd   : > { %p2107_p0 = scmp.ge.s32.totalorder %s2509_s12, 1  ;;  %p49_p1 = scmp.eq.s32.totalorder %s2595_s16, 0 }
   0xe   : > { %p253_p2 = scmp.lt.s32.totalorder %s2509_s12, 3  ;;  %s2511_s18 = smov [#allocation5]  }
   0xf   : > { %s266_s19 = sshll.u32 %s2511_s18, 4  ;;  %s2947_s3 = sld [smem:[#allocation21_spill]]  ;;  %s267_s19 = int_to_ptr.vmem [resolvable:$true] %s266_s19 }
  0x10   : > { %p2600_p3 = pnand %p2107_p0, %p253_p2  ;;  %s2949_s2 = sld [smem:[#allocation20_spill]] }
  0x11   : > { %s2512_s27 = smov [#allocation8]   ;;  %s2513_s29 = smov 512  }
  0x12   : > { %s264_s15 = sshll.u32 %s2945_s1, 4  ;;  %p2158_p4 = pneg %p2600_p3  ;;  %s265_s15 = int_to_ptr.hbm [resolvable:$true] %s264_s15 }
  0x13   : > { %s292_s28 = sshll.u32 %s2512_s27, 4  ;;  %s2514_s13 = smov 32   ;;  %s293_s28 = int_to_ptr.vmem [resolvable:$true] %s292_s28 }
  0x14   : > { %p2612_p6 = pnand %p2158_p4, %p49_p1  ;;  %s305_s20 = sshll.u32 %s2936_s4, 4  ;;  %s306_s20 = int_to_ptr.hbm [resolvable:$true] %s305_s20 }
  0x15   : > { %s290_s22 = sshll.u32 %s2947_s3, 4  ;;  %s2515_s21 = smov [#allocation7]   ;;  %s291_s22 = int_to_ptr.hbm [resolvable:$true] %s290_s22 }
  0x16   : > { %s279_s26 = sshll.u32 %s2949_s2, 4  ;;  %s281_s1 = sshll.u32 %s2515_s21, 4  ;;  %s280_s26 = int_to_ptr.hbm [resolvable:$true] %s279_s26  ;;  %s282_s1 = int_to_ptr.vmem [resolvable:$true] %s281_s1 }
  0x17   : > { %2161 = dma.hbm_to_vmem [thread:$0]  (!%p2612_p6), %s265_s15, 32768, %s267_s19, [#allocation6], %s2513_s29, %s2513_s29, %s2514_s13  }
  0x18   : > { %2167 = dma.hbm_to_vmem [thread:$0]  (!%p2612_p6), %s291_s22, 32768, %s293_s28, [#allocation9], %s2513_s29, %s2513_s29, %s2514_s13  }
  0x19   : > { %2164 = dma.hbm_to_vmem [thread:$0]  (!%p2612_p6), %s280_s26, 64, %s282_s1, [#allocation6]  }
  0x1a   : > { %s2516_s15 = smov [#allocation10]   ;;  %s316_s25 = sshll.u32 %s2937_s5, 4  ;;  %s317_s25 = int_to_ptr.hbm [resolvable:$true] %s316_s25 }
  0x1b   : > { %s307_s19 = sshll.u32 %s2516_s15, 4  ;;  %s2517_s27 = smov [#allocation11]   ;;  %s308_s19 = int_to_ptr.vmem [resolvable:$true] %s307_s19 }
  0x1c   : > { %2170 = dma.hbm_to_vmem [thread:$0]  (!%p2612_p6), %s306_s20, 64, %s308_s19, [#allocation9]  }
  0x1d   : > { %s318_s1 = sshll.u32 %s2517_s27, 4  ;;  %s2518_s26 = smov 128   ;;  %s319_s1 = int_to_ptr.vmem [resolvable:$true] %s318_s1 }
  0x1e   : > { %s2519_s28 = smov 8   ;;  %s2106_s29 = sadd.s32 4294967294, %s2509_s12  }
  0x1f   : > { %2173 = dma.hbm_to_vmem [thread:$0]  (!%p2612_p6), %s317_s25, 8192, %s319_s1, [#allocation12], %s2518_s26, %s2518_s26, %s2519_s28  }
  0x20   : > { %s2637_s13 = sadd.s32 1, %s2509_s12   ;;  %s35_s14 = sadd.s32 1, %s2505_s11 }
  0x21   : > { %s32_s18 = ssub.s32 %s2509_s12, %s2637_s13  ;;  %p42_p7 = scmp.ne.s32.totalorder %s2505_s11, %s2501_s10 }
  0x22   : > { %p33_p8 = scmp.eq.s32.totalorder %s32_s18, 0  ;;  %p43_p9 = scmp.eq.s32.totalorder %s2509_s12, 0 }
  0x23   : > { %p48_p10 = scmp.ne.s32.totalorder %s2501_s10, %s2497_s30  ;;  %p240_p11 = scmp.eq.s32.totalorder %s2595_s16, 1 }
  0x24   : > { %s2649_s20 = scalar_select %p33_p8, %s2505_s11, %s35_s14  }
  0x25   : > { %p2653_p12 = por %p49_p1, %p48_p10  ;;  %p2657_p13 = por %p240_p11, %p42_p7 }
  0x26   : > { %p246_p0 = scmp.eq.s32.totalorder %s2106_s29, 1  ;;  %p44_p2 = por %p43_p9, %p42_p7 }
  0x27   : > { %s341_s15 = sand.u32 1, %s2505_s11   ;;  %p2187_p6 = scmp.lt.s32.totalorder %s2509_s12, 2 }
  0x28   : > { %p2662_p4 = por %p246_p0, %p48_p10  ;;  %s2114_s22 = sshll.u32 %s341_s15, 5 }
  0x29   : > { %s2133_s24 = sshll.u32 %s2509_s12, 5  ;;  %s345_s28 = scalar_lea.vmem [#allocation2], %s2114_s22 }
  0x2a   : > { %s350_s1 = scalar_lea.hbm %s2932_s0, %s2133_s24  ;;  %s354_s14 = sshll.u32 %s345_s28, 4  ;;  %s355_s14 = int_to_ptr.vmem [resolvable:$true] %s354_s14 }
  0x2b   : > { %s352_s26 = sshll.u32 %s350_s1, 4  ;;  %p2671_p8 = pnand %p2187_p6, %p44_p2  ;;  %s353_s26 = int_to_ptr.hbm [resolvable:$true] %s352_s26 }
  0x2c   : > { %s342_s18 = scalar_lea.sflag [#allocation3], %s341_s15  ;;  %s2401_s2 = sshra.s32 %s353_s26, 4  ;;  %s2402_s2 = int_to_ptr.hbm [resolvable:$true] %s2401_s2 }
  0x2d   : > { %s2403_s3 = scalar_lea.hbm %s2402_s2, 32  ;;  %p2405_p9 = pneg %p2671_p8 }
  0x2e   : > { %p2404_p7 = scmp.ne.s32.totalorder %s2402_s2, %s2403_s3  ;;  %s2408_s22 = scalar_lea.hbm %s2932_s0, 64 }
  0x2f   : > { %p2409_p0 = scmp.lt.s32.totalorder %s2402_s2, %s2932_s0  ;;  %p2410_p2 = scmp.lt.s32.totalorder %s2408_s22, %s2403_s3 }
  0x30   : > { %p2406_p10 = pnand %p2405_p9, %p2404_p7 }
  0x31   : > { %p2411_p6 = por %p2410_p2, %p2409_p0 }
  0x32   : > { %p2407_p11 = pneg %p2406_p10 }
  0x34   : > { %p2412_p5 = pnand %p2411_p6, %p2407_p11 }
  0x36   : > { %2415 = shalt.err (!%p2412_p5)
}
  0x37   : > { %2177 = dma.hbm_to_vmem [thread:$0]  (!%p2671_p8), %s353_s26, 512, %s355_s14, %s342_s18  }
  0x38   : > { %363 = sbr.rel (%p2600_p3) target bundleno = 1022 (0x3fe), region = 56  ;;  %s2688_s15 = sand.u32 (!%p2600_p3), 1, %s2501_s10  }
  0x39   : > { %s2118_s28 = sshll.u32 (!%p2600_p3), %s2688_s15, 5  ;;  %s366_s24 = scalar_lea.sflag (!%p2600_p3), [#allocation3], %s2688_s15 }
  0x3a   : > { %s2692_s25 = scalar_lea.vmem (!%p2600_p3), [#allocation2], %s2118_s28 }
  0x3d   : > { %2476 = dma.done.wait (%p2653_p12), %s366_s24, 512  }
  0x3e   : > { %2478 = vsyncadd (%p2653_p12), %s366_s24, 4294966784 }
  0x3f   : > { %2480 = dma.done.wait (%p49_p1), [#allocation6], 32832  }
  0x40   : > { %2482 = vsyncadd (%p49_p1), [#allocation6], 4294934464 }
  0x41   : > { %2484 = dma.done.wait (%p49_p1), [#allocation9], 32832  }
  0x42   : > { %2486 = vsyncadd (%p49_p1), [#allocation9], 4294934464 }
  0x43   : > { %2488 = dma.done.wait (%p49_p1), [#allocation12], 8192  }
  0x44   : > { %2490 = vsyncadd (%p49_p1), [#allocation12], 4294959104  ;;  %v627_v0 = vld [vmem:[#allocation5 + $0x5e0] sm:$0xff]  ;;  %v2711_v62 = vld [vmem:[%s2692_s25 + $0x10] sm:$0xff]  ;;  %s2124_s17 = sshll.u32 %s2688_s15, 3  ;;  %s2130_s23 = sshll.u32 %s2595_s16, 3 }
  0x45   : > { %v499_v1 = vld [vmem:[#allocation5 + $0x1e0] sm:$0xff]  ;;  %744 = vmatpush.msra.mxu2 %v627_v0  ;;  %v628_v0 = vld [vmem:[#allocation5 + $0x5e8] sm:$0xff]  ;;  %s1983_s22 = scalar_lea.hbm %s2941_s9, %s2130_s23  ;;  %s429_s16 = scalar_lea.vmem [#allocation13], %s2124_s17 }
  0x46   : > { %v623_v2 = vld [vmem:[#allocation5 + $0x5c0] sm:$0xff]  ;;  %704 = vmatpush.msra.mxu0 %v499_v1  ;;  %s1985_s28 = sshll.u32 %s429_s16, 4  ;;  %s1987_s24 = sshll.u32 %s1983_s22, 4  ;;  %s1986_s28 = int_to_ptr.vmem [resolvable:$true] %s1985_s28  ;;  %s1988_s24 = int_to_ptr.hbm [resolvable:$true] %s1987_s24 }
  0x47   : > { %v691_v3 = vld [vmem:[#allocation5 + $0x7e0] sm:$0xff]  ;;  %745 = vmatpush.msra.mxu2 %v623_v2  ;;  %v2717_v2 = vld [vmem:[%s2692_s25 + $0x18] sm:$0xff]  ;;  %s2445_s2 = sshra.s32 %s1988_s24, 4  ;;  %s2451_s14 = scalar_lea.hbm %s2941_s9, 16  ;;  %s2446_s2 = int_to_ptr.hbm [resolvable:$true] %s2445_s2 }
  0x48   : > { %v495_v4 = vld [vmem:[#allocation5 + $0x1c0] sm:$0xff]  ;;  %764 = vmatpush.msra.mxu3 %v691_v3  ;;  %v500_v3 = vld [vmem:[#allocation5 + $0x1e8] sm:$0xff]  ;;  %s2447_s3 = scalar_lea.hbm %s2446_s2, 8  ;;  %p2452_p12 = scmp.lt.s32.totalorder %s2446_s2, %s2941_s9 }
  0x49   : > { %v563_v5 = vld [vmem:[#allocation5 + $0x3e0] sm:$0xff]  ;;  %705 = vmatpush.msra.mxu0 %v495_v4  ;;  %v624_v4 = vld [vmem:[#allocation5 + $0x5c8] sm:$0xff]  ;;  %p2448_p1 = scmp.ne.s32.totalorder %s2446_s2, %s2447_s3  ;;  %p2453_p8 = scmp.lt.s32.totalorder %s2451_s14, %s2447_s3 }
  0x4a   : > { %724 = vmatpush.msra.mxu1 %v563_v5  ;;  %v619_v6 = vld [vmem:[#allocation5 + $0x5a0] sm:$0xff]  ;;  %v692_v5 = vld [vmem:[#allocation5 + $0x7e8] sm:$0xff] }
  0x4b   : > { %v687_v7 = vld [vmem:[#allocation5 + $0x7c0] sm:$0xff]  ;;  %746 = vmatpush.msra.mxu2 %v619_v6  ;;  %p2449_p3 = pnand %p2448_p1, %p2657_p13  ;;  %p2454_p7 = por %p2453_p8, %p2452_p12 }
  0x4c   : > { %v491_v8 = vld [vmem:[#allocation5 + $0x1a0] sm:$0xff]  ;;  %765 = vmatpush.msra.mxu3 %v687_v7  ;;  %v496_v7 = vld [vmem:[#allocation5 + $0x1c8] sm:$0xff] }
  0x4d   : > { %v559_v9 = vld [vmem:[#allocation5 + $0x3c0] sm:$0xff]  ;;  %706 = vmatpush.msra.mxu0 %v491_v8  ;;  %v2723_v8 = vld [vmem:[%s2692_s25 + $0x8] sm:$0xff]  ;;  %p2450_p5 = pneg %p2449_p3 }
  0x4e   : > { %v683_v10 = vld [vmem:[#allocation5 + $0x7a0] sm:$0xff]  ;;  %725 = vmatpush.msra.mxu1 %v559_v9  ;;  %v620_v9 = vld [vmem:[#allocation5 + $0x5a8] sm:$0xff] }
  0x4f   : > { %v615_v11 = vld [vmem:[#allocation5 + $0x580] sm:$0xff]  ;;  %766 = vmatpush.msra.mxu3 %v683_v10  ;;  %v564_v10 = vld [vmem:[#allocation5 + $0x3e8] sm:$0xff]  ;;  %p2455_p9 = pnand %p2454_p7, %p2450_p5 }
  0x50   : > { %v487_v12 = vld [vmem:[#allocation5 + $0x180] sm:$0xff]  ;;  %747 = vmatpush.msra.mxu2 %v615_v11  ;;  %v688_v11 = vld [vmem:[#allocation5 + $0x7c8] sm:$0xff] }
  0x51   : > { %v555_v13 = vld [vmem:[#allocation5 + $0x3a0] sm:$0xff]  ;;  %707 = vmatpush.msra.mxu0 %v487_v12  ;;  %v492_v12 = vld [vmem:[#allocation5 + $0x1a8] sm:$0xff] }
  0x52   : > { %v679_v14 = vld [vmem:[#allocation5 + $0x780] sm:$0xff]  ;;  %726 = vmatpush.msra.mxu1 %v555_v13  ;;  %v616_v13 = vld [vmem:[#allocation5 + $0x588] sm:$0xff] }
  0x53   : > { %v551_v15 = vld [vmem:[#allocation5 + $0x380] sm:$0xff]  ;;  %767 = vmatpush.msra.mxu3 %v679_v14  ;;  %v560_v14 = vld [vmem:[#allocation5 + $0x3c8] sm:$0xff] }
  0x54   : > { %v611_v16 = vld [vmem:[#allocation5 + $0x560] sm:$0xff]  ;;  %727 = vmatpush.msra.mxu1 %v551_v15  ;;  %v684_v15 = vld [vmem:[#allocation5 + $0x7a8] sm:$0xff] }
  0x55   : > { %v483_v17 = vld [vmem:[#allocation5 + $0x160] sm:$0xff]  ;;  %748 = vmatpush.msra.mxu2 %v611_v16  ;;  %v488_v16 = vld [vmem:[#allocation5 + $0x188] sm:$0xff] }
  0x56   : > { %v675_v18 = vld [vmem:[#allocation5 + $0x760] sm:$0xff]  ;;  %708 = vmatpush.msra.mxu0 %v483_v17  ;;  %v612_v17 = vld [vmem:[#allocation5 + $0x568] sm:$0xff] }
  0x57   : > { %v547_v19 = vld [vmem:[#allocation5 + $0x360] sm:$0xff]  ;;  %768 = vmatpush.msra.mxu3 %v675_v18  ;;  %v556_v18 = vld [vmem:[#allocation5 + $0x3a8] sm:$0xff] }
  0x58   : > { %v607_v20 = vld [vmem:[#allocation5 + $0x540] sm:$0xff]  ;;  %728 = vmatpush.msra.mxu1 %v547_v19  ;;  %v680_v19 = vld [vmem:[#allocation5 + $0x788] sm:$0xff] }
  0x59   : > { %v479_v21 = vld [vmem:[#allocation5 + $0x140] sm:$0xff]  ;;  %749 = vmatpush.msra.mxu2 %v607_v20  ;;  %v484_v20 = vld [vmem:[#allocation5 + $0x168] sm:$0xff] }
  0x5a   : > { %v671_v22 = vld [vmem:[#allocation5 + $0x740] sm:$0xff]  ;;  %709 = vmatpush.msra.mxu0 %v479_v21  ;;  %v608_v21 = vld [vmem:[#allocation5 + $0x548] sm:$0xff] }
  0x5b   : > { %v543_v23 = vld [vmem:[#allocation5 + $0x340] sm:$0xff]  ;;  %769 = vmatpush.msra.mxu3 %v671_v22  ;;  %v552_v22 = vld [vmem:[#allocation5 + $0x388] sm:$0xff] }
  0x5c   : > { %v603_v24 = vld [vmem:[#allocation5 + $0x520] sm:$0xff]  ;;  %729 = vmatpush.msra.mxu1 %v543_v23  ;;  %v676_v23 = vld [vmem:[#allocation5 + $0x768] sm:$0xff] }
  0x5d   : > { %v475_v25 = vld [vmem:[#allocation5 + $0x120] sm:$0xff]  ;;  %750 = vmatpush.msra.mxu2 %v603_v24  ;;  %v480_v24 = vld [vmem:[#allocation5 + $0x148] sm:$0xff] }
  0x5e   : > { %v667_v26 = vld [vmem:[#allocation5 + $0x720] sm:$0xff]  ;;  %710 = vmatpush.msra.mxu0 %v475_v25  ;;  %v604_v25 = vld [vmem:[#allocation5 + $0x528] sm:$0xff] }
  0x5f   : > { %v539_v27 = vld [vmem:[#allocation5 + $0x320] sm:$0xff]  ;;  %770 = vmatpush.msra.mxu3 %v667_v26  ;;  %v548_v26 = vld [vmem:[#allocation5 + $0x368] sm:$0xff] }
  0x60   : > { %v599_v28 = vld [vmem:[#allocation5 + $0x500] sm:$0xff]  ;;  %730 = vmatpush.msra.mxu1 %v539_v27  ;;  %v672_v27 = vld [vmem:[#allocation5 + $0x748] sm:$0xff] }
  0x61   : > { %v471_v29 = vld [vmem:[#allocation5 + $0x100] sm:$0xff]  ;;  %751 = vmatpush.msra.mxu2 %v599_v28  ;;  %v476_v28 = vld [vmem:[#allocation5 + $0x128] sm:$0xff] }
  0x62   : > { %v663_v30 = vld [vmem:[#allocation5 + $0x700] sm:$0xff]  ;;  %711 = vmatpush.msra.mxu0 %v471_v29  ;;  %v600_v29 = vld [vmem:[#allocation5 + $0x508] sm:$0xff] }
  0x63   : > { %v535_v31 = vld [vmem:[#allocation5 + $0x300] sm:$0xff]  ;;  %771 = vmatpush.msra.mxu3 %v663_v30  ;;  %v544_v30 = vld [vmem:[#allocation5 + $0x348] sm:$0xff] }
  0x64   : > { %v595_v32 = vld [vmem:[#allocation5 + $0x4e0] sm:$0xff]  ;;  %731 = vmatpush.msra.mxu1 %v535_v31  ;;  %v668_v31 = vld [vmem:[#allocation5 + $0x728] sm:$0xff] }
  0x65   : > { %v467_v33 = vld [vmem:[#allocation5 + $0xe0] sm:$0xff]  ;;  %752 = vmatpush.msra.mxu2 %v595_v32  ;;  %v472_v32 = vld [vmem:[#allocation5 + $0x108] sm:$0xff] }
  0x66   : > { %v659_v34 = vld [vmem:[#allocation5 + $0x6e0] sm:$0xff]  ;;  %712 = vmatpush.msra.mxu0 %v467_v33  ;;  %v596_v33 = vld [vmem:[#allocation5 + $0x4e8] sm:$0xff] }
  0x67   : > { %v531_v35 = vld [vmem:[#allocation5 + $0x2e0] sm:$0xff]  ;;  %772 = vmatpush.msra.mxu3 %v659_v34  ;;  %v540_v34 = vld [vmem:[#allocation5 + $0x328] sm:$0xff] }
  0x68   : > { %v591_v36 = vld [vmem:[#allocation5 + $0x4c0] sm:$0xff]  ;;  %732 = vmatpush.msra.mxu1 %v531_v35  ;;  %v664_v35 = vld [vmem:[#allocation5 + $0x708] sm:$0xff] }
  0x69   : > { %v463_v37 = vld [vmem:[#allocation5 + $0xc0] sm:$0xff]  ;;  %753 = vmatpush.msra.mxu2 %v591_v36  ;;  %v468_v36 = vld [vmem:[#allocation5 + $0xe8] sm:$0xff] }
  0x6a   : > { %v655_v38 = vld [vmem:[#allocation5 + $0x6c0] sm:$0xff]  ;;  %713 = vmatpush.msra.mxu0 %v463_v37  ;;  %v592_v37 = vld [vmem:[#allocation5 + $0x4c8] sm:$0xff] }
  0x6b   : > { %v527_v39 = vld [vmem:[#allocation5 + $0x2c0] sm:$0xff]  ;;  %773 = vmatpush.msra.mxu3 %v655_v38  ;;  %v536_v38 = vld [vmem:[#allocation5 + $0x308] sm:$0xff] }
  0x6c   : > { %v587_v40 = vld [vmem:[#allocation5 + $0x4a0] sm:$0xff]  ;;  %733 = vmatpush.msra.mxu1 %v527_v39  ;;  %v660_v39 = vld [vmem:[#allocation5 + $0x6e8] sm:$0xff] }
  0x6d   : > { %v459_v41 = vld [vmem:[#allocation5 + $0xa0] sm:$0xff]  ;;  %754 = vmatpush.msra.mxu2 %v587_v40  ;;  %v464_v40 = vld [vmem:[#allocation5 + $0xc8] sm:$0xff] }
  0x6e   : > { %v651_v42 = vld [vmem:[#allocation5 + $0x6a0] sm:$0xff]  ;;  %714 = vmatpush.msra.mxu0 %v459_v41  ;;  %v588_v41 = vld [vmem:[#allocation5 + $0x4a8] sm:$0xff] }
  0x6f   : > { %v523_v43 = vld [vmem:[#allocation5 + $0x2a0] sm:$0xff]  ;;  %774 = vmatpush.msra.mxu3 %v651_v42  ;;  %v532_v42 = vld [vmem:[#allocation5 + $0x2e8] sm:$0xff] }
  0x70   : > { %v583_v44 = vld [vmem:[#allocation5 + $0x480] sm:$0xff]  ;;  %734 = vmatpush.msra.mxu1 %v523_v43  ;;  %v656_v43 = vld [vmem:[#allocation5 + $0x6c8] sm:$0xff] }
  0x71   : > { %v455_v45 = vld [vmem:[#allocation5 + $0x80] sm:$0xff]  ;;  %755 = vmatpush.msra.mxu2 %v583_v44  ;;  %v460_v44 = vld [vmem:[#allocation5 + $0xa8] sm:$0xff] }
  0x72   : > { %v647_v46 = vld [vmem:[#allocation5 + $0x680] sm:$0xff]  ;;  %715 = vmatpush.msra.mxu0 %v455_v45  ;;  %v584_v45 = vld [vmem:[#allocation5 + $0x488] sm:$0xff] }
  0x73   : > { %v519_v47 = vld [vmem:[#allocation5 + $0x280] sm:$0xff]  ;;  %775 = vmatpush.msra.mxu3 %v647_v46  ;;  %v528_v46 = vld [vmem:[#allocation5 + $0x2c8] sm:$0xff] }
  0x74   : > { %v579_v48 = vld [vmem:[#allocation5 + $0x460] sm:$0xff]  ;;  %735 = vmatpush.msra.mxu1 %v519_v47  ;;  %v652_v47 = vld [vmem:[#allocation5 + $0x6a8] sm:$0xff] }
  0x75   : > { %v451_v49 = vld [vmem:[#allocation5 + $0x60] sm:$0xff]  ;;  %756 = vmatpush.msra.mxu2 %v579_v48  ;;  %v456_v48 = vld [vmem:[#allocation5 + $0x88] sm:$0xff] }
  0x76   : > { %v643_v50 = vld [vmem:[#allocation5 + $0x660] sm:$0xff]  ;;  %716 = vmatpush.msra.mxu0 %v451_v49  ;;  %v580_v49 = vld [vmem:[#allocation5 + $0x468] sm:$0xff] }
  0x77   : > { %v515_v51 = vld [vmem:[#allocation5 + $0x260] sm:$0xff]  ;;  %776 = vmatpush.msra.mxu3 %v643_v50  ;;  %v524_v50 = vld [vmem:[#allocation5 + $0x2a8] sm:$0xff] }
  0x78   : > { %v575_v52 = vld [vmem:[#allocation5 + $0x440] sm:$0xff]  ;;  %736 = vmatpush.msra.mxu1 %v515_v51  ;;  %v648_v51 = vld [vmem:[#allocation5 + $0x688] sm:$0xff] }
  0x79   : > { %v447_v53 = vld [vmem:[#allocation5 + $0x40] sm:$0xff]  ;;  %757 = vmatpush.msra.mxu2 %v575_v52  ;;  %v452_v52 = vld [vmem:[#allocation5 + $0x68] sm:$0xff] }
  0x7a   : > { %v639_v54 = vld [vmem:[#allocation5 + $0x640] sm:$0xff]  ;;  %717 = vmatpush.msra.mxu0 %v447_v53  ;;  %v576_v53 = vld [vmem:[#allocation5 + $0x448] sm:$0xff] }
  0x7b   : > { %v511_v55 = vld [vmem:[#allocation5 + $0x240] sm:$0xff]  ;;  %777 = vmatpush.msra.mxu3 %v639_v54  ;;  %v520_v54 = vld [vmem:[#allocation5 + $0x288] sm:$0xff] }
  0x7c   : > { %v571_v56 = vld [vmem:[#allocation5 + $0x420] sm:$0xff]  ;;  %737 = vmatpush.msra.mxu1 %v511_v55  ;;  %v644_v55 = vld [vmem:[#allocation5 + $0x668] sm:$0xff] }
  0x7d   : > { %v443_v57 = vld [vmem:[#allocation5 + $0x20] sm:$0xff]  ;;  %758 = vmatpush.msra.mxu2 %v571_v56  ;;  %v448_v56 = vld [vmem:[#allocation5 + $0x48] sm:$0xff] }
  0x7e   : > { %v635_v58 = vld [vmem:[#allocation5 + $0x620] sm:$0xff]  ;;  %718 = vmatpush.msra.mxu0 %v443_v57  ;;  %v572_v57 = vld [vmem:[#allocation5 + $0x428] sm:$0xff] }
  0x7f   : > { %v507_v59 = vld [vmem:[#allocation5 + $0x220] sm:$0xff]  ;;  %778 = vmatpush.msra.mxu3 %v635_v58  ;;  %v516_v58 = vld [vmem:[#allocation5 + $0x268] sm:$0xff] }
  0x80   : > { %v567_v60 = vld [vmem:[#allocation5 + $0x400] sm:$0xff]  ;;  %738 = vmatpush.msra.mxu1 %v507_v59  ;;  %v640_v59 = vld [vmem:[#allocation5 + $0x648] sm:$0xff] }
  0x81   : > { %v439_v61 = vld [vmem:[#allocation5] sm:$0xff]  ;;  %759 = vmatpush.msra.mxu2 %v567_v60  ;;  %v444_v60 = vld [vmem:[#allocation5 + $0x28] sm:$0xff] }
  0x82   : > { %v631_v63 = vld [vmem:[#allocation5 + $0x600] sm:$0xff]  ;;  %719 = vmatpush.msra.mxu0 %v439_v61  ;;  %760 = vmatmul.f32.vlgmr.msra.gmra.mxu2 %v2711_v62  ;;  %v568_v61 = vld [vmem:[#allocation5 + $0x408] sm:$0xff] }
  0x83   : > { %v2714_v1 = vld [vmem:[%s2692_s25] sm:$0xff]  ;;  %779 = vmatpush.msra.mxu3 %v631_v63  ;;  %824 = vmatpush.msrb.mxu2 %v628_v0  ;;  %v512_v63 = vld [vmem:[#allocation5 + $0x248] sm:$0xff]  ;;  %s1973_s25 = scalar_lea.sflag [#allocation4], %s2688_s15 }
  0x84   : > { %720 = vmatmul.f32.vlgmr.msra.gmra.mxu0 %v2714_v1  ;;  %v503_v6 = vld [vmem:[#allocation5 + $0x200] sm:$0xff]  ;;  %780 = vmatmul.f32.vlgmr.msra.gmra.mxu3 %v2717_v2  ;;  %v636_v0 = vld [vmem:[#allocation5 + $0x628] sm:$0xff] }
  0x85   : > { %784 = vmatpush.msrb.mxu0 %v500_v3  ;;  %825 = vmatpush.msrb.mxu2 %v624_v4  ;;  %v440_v3 = vld [vmem:[#allocation5 + $0x8] sm:$0xff]  ;;  %v629_v4 = vld [vmem:[#allocation5 + $0x5f0] sm:$0xff] }
  0x86   : > { %844 = vmatpush.msrb.mxu3 %v692_v5  ;;  %739 = vmatpush.msra.mxu1 %v503_v6  ;;  %v508_v5 = vld [vmem:[#allocation5 + $0x228] sm:$0xff] }
  0x87   : > { %785 = vmatpush.msrb.mxu0 %v496_v7  ;;  %740 = vmatmul.f32.vlgmr.msra.gmra.mxu1 %v2723_v8  ;;  %v632_v6 = vld [vmem:[#allocation5 + $0x608] sm:$0xff]  ;;  %v501_v7 = vld [vmem:[#allocation5 + $0x1f0] sm:$0xff] }
  0x88   : > { %826 = vmatpush.msrb.mxu2 %v620_v9  ;;  %804 = vmatpush.msrb.mxu1 %v564_v10  ;;  %v625_v9 = vld [vmem:[#allocation5 + $0x5d0] sm:$0xff] }
  0x89   : > { %845 = vmatpush.msrb.mxu3 %v688_v11  ;;  %786 = vmatpush.msrb.mxu0 %v492_v12  ;;  %v693_v10 = vld [vmem:[#allocation5 + $0x7f0] sm:$0xff]  ;;  %v504_v11 = vld [vmem:[#allocation5 + $0x208] sm:$0xff] }
  0x8a   : > { %827 = vmatpush.msrb.mxu2 %v616_v13  ;;  %805 = vmatpush.msrb.mxu1 %v560_v14  ;;  %v497_v12 = vld [vmem:[#allocation5 + $0x1d0] sm:$0xff] }
  0x8b   : > { %846 = vmatpush.msrb.mxu3 %v684_v15  ;;  %787 = vmatpush.msrb.mxu0 %v488_v16  ;;  %v621_v13 = vld [vmem:[#allocation5 + $0x5b0] sm:$0xff] }
  0x8c   : > { %828 = vmatpush.msrb.mxu2 %v612_v17  ;;  %806 = vmatpush.msrb.mxu1 %v556_v18  ;;  %v565_v14 = vld [vmem:[#allocation5 + $0x3f0] sm:$0xff] }
  0x8d   : > { %847 = vmatpush.msrb.mxu3 %v680_v19  ;;  %788 = vmatpush.msrb.mxu0 %v484_v20  ;;  %v689_v15 = vld [vmem:[#allocation5 + $0x7d0] sm:$0xff] }
  0x8e   : > { %829 = vmatpush.msrb.mxu2 %v608_v21  ;;  %807 = vmatpush.msrb.mxu1 %v552_v22  ;;  %v493_v16 = vld [vmem:[#allocation5 + $0x1b0] sm:$0xff] }
  0x8f   : > { %848 = vmatpush.msrb.mxu3 %v676_v23  ;;  %789 = vmatpush.msrb.mxu0 %v480_v24  ;;  %v617_v17 = vld [vmem:[#allocation5 + $0x590] sm:$0xff] }
  0x90   : > { %830 = vmatpush.msrb.mxu2 %v604_v25  ;;  %808 = vmatpush.msrb.mxu1 %v548_v26  ;;  %v561_v18 = vld [vmem:[#allocation5 + $0x3d0] sm:$0xff] }
  0x91   : > { %849 = vmatpush.msrb.mxu3 %v672_v27  ;;  %790 = vmatpush.msrb.mxu0 %v476_v28  ;;  %v685_v19 = vld [vmem:[#allocation5 + $0x7b0] sm:$0xff] }
  0x92   : > { %831 = vmatpush.msrb.mxu2 %v600_v29  ;;  %809 = vmatpush.msrb.mxu1 %v544_v30  ;;  %v489_v20 = vld [vmem:[#allocation5 + $0x190] sm:$0xff] }
  0x93   : > { %850 = vmatpush.msrb.mxu3 %v668_v31  ;;  %791 = vmatpush.msrb.mxu0 %v472_v32  ;;  %v613_v21 = vld [vmem:[#allocation5 + $0x570] sm:$0xff] }
  0x94   : > { %832 = vmatpush.msrb.mxu2 %v596_v33  ;;  %810 = vmatpush.msrb.mxu1 %v540_v34  ;;  %v557_v22 = vld [vmem:[#allocation5 + $0x3b0] sm:$0xff] }
  0x95   : > { %851 = vmatpush.msrb.mxu3 %v664_v35  ;;  %792 = vmatpush.msrb.mxu0 %v468_v36  ;;  %v681_v23 = vld [vmem:[#allocation5 + $0x790] sm:$0xff] }
  0x96   : > { %833 = vmatpush.msrb.mxu2 %v592_v37  ;;  %811 = vmatpush.msrb.mxu1 %v536_v38  ;;  %v485_v24 = vld [vmem:[#allocation5 + $0x170] sm:$0xff] }
  0x97   : > { %852 = vmatpush.msrb.mxu3 %v660_v39  ;;  %793 = vmatpush.msrb.mxu0 %v464_v40  ;;  %v609_v25 = vld [vmem:[#allocation5 + $0x550] sm:$0xff] }
  0x98   : > { %834 = vmatpush.msrb.mxu2 %v588_v41  ;;  %812 = vmatpush.msrb.mxu1 %v532_v42  ;;  %v553_v26 = vld [vmem:[#allocation5 + $0x390] sm:$0xff] }
  0x99   : > { %853 = vmatpush.msrb.mxu3 %v656_v43  ;;  %794 = vmatpush.msrb.mxu0 %v460_v44  ;;  %v677_v27 = vld [vmem:[#allocation5 + $0x770] sm:$0xff] }
  0x9a   : > { %835 = vmatpush.msrb.mxu2 %v584_v45  ;;  %813 = vmatpush.msrb.mxu1 %v528_v46  ;;  %v481_v28 = vld [vmem:[#allocation5 + $0x150] sm:$0xff] }
  0x9b   : > { %854 = vmatpush.msrb.mxu3 %v652_v47  ;;  %795 = vmatpush.msrb.mxu0 %v456_v48  ;;  %v605_v29 = vld [vmem:[#allocation5 + $0x530] sm:$0xff] }
  0x9c   : > { %836 = vmatpush.msrb.mxu2 %v580_v49  ;;  %814 = vmatpush.msrb.mxu1 %v524_v50  ;;  %v549_v30 = vld [vmem:[#allocation5 + $0x370] sm:$0xff] }
  0x9d   : > { %855 = vmatpush.msrb.mxu3 %v648_v51  ;;  %796 = vmatpush.msrb.mxu0 %v452_v52  ;;  %v673_v31 = vld [vmem:[#allocation5 + $0x750] sm:$0xff] }
  0x9e   : > { %837 = vmatpush.msrb.mxu2 %v576_v53  ;;  %815 = vmatpush.msrb.mxu1 %v520_v54  ;;  %v477_v32 = vld [vmem:[#allocation5 + $0x130] sm:$0xff] }
  0x9f   : > { %856 = vmatpush.msrb.mxu3 %v644_v55  ;;  %797 = vmatpush.msrb.mxu0 %v448_v56  ;;  %v601_v33 = vld [vmem:[#allocation5 + $0x510] sm:$0xff] }
  0xa0   : > { %838 = vmatpush.msrb.mxu2 %v572_v57  ;;  %816 = vmatpush.msrb.mxu1 %v516_v58  ;;  %v545_v34 = vld [vmem:[#allocation5 + $0x350] sm:$0xff] }
  0xa1   : > { %857 = vmatpush.msrb.mxu3 %v640_v59  ;;  %798 = vmatpush.msrb.mxu0 %v444_v60  ;;  %v669_v35 = vld [vmem:[#allocation5 + $0x730] sm:$0xff] }
  0xa2   : > { %839 = vmatpush.msrb.mxu2 %v568_v61  ;;  %817 = vmatpush.msrb.mxu1 %v512_v63  ;;  %v473_v36 = vld [vmem:[#allocation5 + $0x110] sm:$0xff] }
  0xa3   : > { %858 = vmatpush.msrb.mxu3 %v636_v0  ;;  %840 = vmatmul.f32.vlgmr.msrb.gmra.mxu2 %v2711_v62  ;;  %v597_v37 = vld [vmem:[#allocation5 + $0x4f0] sm:$0xff] }
  0xa4   : > { %799 = vmatpush.msrb.mxu0 %v440_v3  ;;  %904 = vmatpush.msra.mxu2 %v629_v4  ;;  %v541_v38 = vld [vmem:[#allocation5 + $0x330] sm:$0xff] }
  0xa5   : > { %818 = vmatpush.msrb.mxu1 %v508_v5  ;;  %859 = vmatpush.msrb.mxu3 %v632_v6  ;;  %v665_v39 = vld [vmem:[#allocation5 + $0x710] sm:$0xff] }
  0xa6   : > { %800 = vmatmul.f32.vlgmr.msrb.gmra.mxu0 %v2714_v1  ;;  %860 = vmatmul.f32.vlgmr.msrb.gmra.mxu3 %v2717_v2  ;;  %v469_v40 = vld [vmem:[#allocation5 + $0xf0] sm:$0xff] }
  0xa7   : > { %864 = vmatpush.msra.mxu0 %v501_v7  ;;  %905 = vmatpush.msra.mxu2 %v625_v9  ;;  %v593_v41 = vld [vmem:[#allocation5 + $0x4d0] sm:$0xff]  ;;  %v630_v9 = vld [vmem:[#allocation5 + $0x5f8] sm:$0xff] }
  0xa8   : > { %924 = vmatpush.msra.mxu3 %v693_v10  ;;  %819 = vmatpush.msrb.mxu1 %v504_v11  ;;  %v537_v42 = vld [vmem:[#allocation5 + $0x310] sm:$0xff] }
  0xa9   : > { %865 = vmatpush.msra.mxu0 %v497_v12  ;;  %820 = vmatmul.f32.vlgmr.msrb.gmra.mxu1 %v2723_v8  ;;  %v661_v43 = vld [vmem:[#allocation5 + $0x6f0] sm:$0xff]  ;;  %v502_v12 = vld [vmem:[#allocation5 + $0x1f8] sm:$0xff] }
  0xaa   : > { %906 = vmatpush.msra.mxu2 %v621_v13  ;;  %884 = vmatpush.msra.mxu1 %v565_v14  ;;  %v465_v44 = vld [vmem:[#allocation5 + $0xd0] sm:$0xff]  ;;  %v626_v13 = vld [vmem:[#allocation5 + $0x5d8] sm:$0xff] }
  0xab   : > { %925 = vmatpush.msra.mxu3 %v689_v15  ;;  %866 = vmatpush.msra.mxu0 %v493_v16  ;;  %v589_v45 = vld [vmem:[#allocation5 + $0x4b0] sm:$0xff]  ;;  %v694_v14 = vld [vmem:[#allocation5 + $0x7f8] sm:$0xff] }
  0xac   : > { %907 = vmatpush.msra.mxu2 %v617_v17  ;;  %885 = vmatpush.msra.mxu1 %v561_v18  ;;  %v533_v46 = vld [vmem:[#allocation5 + $0x2f0] sm:$0xff]  ;;  %v498_v16 = vld [vmem:[#allocation5 + $0x1d8] sm:$0xff] }
  0xad   : > { %926 = vmatpush.msra.mxu3 %v685_v19  ;;  %867 = vmatpush.msra.mxu0 %v489_v20  ;;  %v657_v47 = vld [vmem:[#allocation5 + $0x6d0] sm:$0xff]  ;;  %v622_v17 = vld [vmem:[#allocation5 + $0x5b8] sm:$0xff] }
  0xae   : > { %908 = vmatpush.msra.mxu2 %v613_v21  ;;  %886 = vmatpush.msra.mxu1 %v557_v22  ;;  %v461_v48 = vld [vmem:[#allocation5 + $0xb0] sm:$0xff]  ;;  %v566_v18 = vld [vmem:[#allocation5 + $0x3f8] sm:$0xff] }
  0xaf   : > { %927 = vmatpush.msra.mxu3 %v681_v23  ;;  %868 = vmatpush.msra.mxu0 %v485_v24  ;;  %v585_v49 = vld [vmem:[#allocation5 + $0x490] sm:$0xff]  ;;  %v690_v19 = vld [vmem:[#allocation5 + $0x7d8] sm:$0xff] }
  0xb0   : > { %909 = vmatpush.msra.mxu2 %v609_v25  ;;  %887 = vmatpush.msra.mxu1 %v553_v26  ;;  %v529_v50 = vld [vmem:[#allocation5 + $0x2d0] sm:$0xff]  ;;  %v494_v20 = vld [vmem:[#allocation5 + $0x1b8] sm:$0xff] }
  0xb1   : > { %928 = vmatpush.msra.mxu3 %v677_v27  ;;  %869 = vmatpush.msra.mxu0 %v481_v28  ;;  %v653_v51 = vld [vmem:[#allocation5 + $0x6b0] sm:$0xff]  ;;  %v618_v21 = vld [vmem:[#allocation5 + $0x598] sm:$0xff] }
  0xb2   : > { %910 = vmatpush.msra.mxu2 %v605_v29  ;;  %888 = vmatpush.msra.mxu1 %v549_v30  ;;  %v457_v52 = vld [vmem:[#allocation5 + $0x90] sm:$0xff]  ;;  %v562_v22 = vld [vmem:[#allocation5 + $0x3d8] sm:$0xff] }
  0xb3   : > { %929 = vmatpush.msra.mxu3 %v673_v31  ;;  %870 = vmatpush.msra.mxu0 %v477_v32  ;;  %v581_v53 = vld [vmem:[#allocation5 + $0x470] sm:$0xff]  ;;  %v686_v23 = vld [vmem:[#allocation5 + $0x7b8] sm:$0xff] }
  0xb4   : > { %911 = vmatpush.msra.mxu2 %v601_v33  ;;  %889 = vmatpush.msra.mxu1 %v545_v34  ;;  %v525_v54 = vld [vmem:[#allocation5 + $0x2b0] sm:$0xff]  ;;  %v490_v24 = vld [vmem:[#allocation5 + $0x198] sm:$0xff] }
  0xb5   : > { %930 = vmatpush.msra.mxu3 %v669_v35  ;;  %871 = vmatpush.msra.mxu0 %v473_v36  ;;  %v649_v55 = vld [vmem:[#allocation5 + $0x690] sm:$0xff]  ;;  %v614_v25 = vld [vmem:[#allocation5 + $0x578] sm:$0xff] }
  0xb6   : > { %912 = vmatpush.msra.mxu2 %v597_v37  ;;  %890 = vmatpush.msra.mxu1 %v541_v38  ;;  %v453_v56 = vld [vmem:[#allocation5 + $0x70] sm:$0xff]  ;;  %v558_v26 = vld [vmem:[#allocation5 + $0x3b8] sm:$0xff] }
  0xb7   : > { %931 = vmatpush.msra.mxu3 %v665_v39  ;;  %872 = vmatpush.msra.mxu0 %v469_v40  ;;  %v577_v57 = vld [vmem:[#allocation5 + $0x450] sm:$0xff]  ;;  %v682_v27 = vld [vmem:[#allocation5 + $0x798] sm:$0xff] }
  0xb8   : > { %913 = vmatpush.msra.mxu2 %v593_v41  ;;  %891 = vmatpush.msra.mxu1 %v537_v42  ;;  %v521_v58 = vld [vmem:[#allocation5 + $0x290] sm:$0xff]  ;;  %v486_v28 = vld [vmem:[#allocation5 + $0x178] sm:$0xff] }
  0xb9   : > { %932 = vmatpush.msra.mxu3 %v661_v43  ;;  %873 = vmatpush.msra.mxu0 %v465_v44  ;;  %v645_v59 = vld [vmem:[#allocation5 + $0x670] sm:$0xff]  ;;  %v610_v29 = vld [vmem:[#allocation5 + $0x558] sm:$0xff] }
  0xba   : > { %914 = vmatpush.msra.mxu2 %v589_v45  ;;  %892 = vmatpush.msra.mxu1 %v533_v46  ;;  %v449_v60 = vld [vmem:[#allocation5 + $0x50] sm:$0xff]  ;;  %v554_v30 = vld [vmem:[#allocation5 + $0x398] sm:$0xff] }
  0xbb   : > { %933 = vmatpush.msra.mxu3 %v657_v47  ;;  %874 = vmatpush.msra.mxu0 %v461_v48  ;;  %v573_v61 = vld [vmem:[#allocation5 + $0x430] sm:$0xff]  ;;  %v678_v31 = vld [vmem:[#allocation5 + $0x778] sm:$0xff] }
  0xbc   : > { %915 = vmatpush.msra.mxu2 %v585_v49  ;;  %893 = vmatpush.msra.mxu1 %v529_v50  ;;  %v517_v63 = vld [vmem:[#allocation5 + $0x270] sm:$0xff]  ;;  %v482_v32 = vld [vmem:[#allocation5 + $0x158] sm:$0xff] }
  0xbd   : > { %934 = vmatpush.msra.mxu3 %v653_v51  ;;  %875 = vmatpush.msra.mxu0 %v457_v52  ;;  %v641_v0 = vld [vmem:[#allocation5 + $0x650] sm:$0xff]  ;;  %v606_v33 = vld [vmem:[#allocation5 + $0x538] sm:$0xff] }
  0xbe   : > { %916 = vmatpush.msra.mxu2 %v581_v53  ;;  %894 = vmatpush.msra.mxu1 %v525_v54  ;;  %v445_v3 = vld [vmem:[#allocation5 + $0x30] sm:$0xff]  ;;  %v550_v34 = vld [vmem:[#allocation5 + $0x378] sm:$0xff] }
  0xbf   : > { %935 = vmatpush.msra.mxu3 %v649_v55  ;;  %876 = vmatpush.msra.mxu0 %v453_v56  ;;  %v569_v4 = vld [vmem:[#allocation5 + $0x410] sm:$0xff]  ;;  %v674_v35 = vld [vmem:[#allocation5 + $0x758] sm:$0xff] }
  0xc0   : > { %917 = vmatpush.msra.mxu2 %v577_v57  ;;  %895 = vmatpush.msra.mxu1 %v521_v58  ;;  %v513_v5 = vld [vmem:[#allocation5 + $0x250] sm:$0xff]  ;;  %v478_v36 = vld [vmem:[#allocation5 + $0x138] sm:$0xff] }
  0xc1   : > { %936 = vmatpush.msra.mxu3 %v645_v59  ;;  %877 = vmatpush.msra.mxu0 %v449_v60  ;;  %v637_v6 = vld [vmem:[#allocation5 + $0x630] sm:$0xff]  ;;  %v602_v37 = vld [vmem:[#allocation5 + $0x518] sm:$0xff] }
  0xc2   : > { %918 = vmatpush.msra.mxu2 %v573_v61  ;;  %896 = vmatpush.msra.mxu1 %v517_v63  ;;  %v441_v7 = vld [vmem:[#allocation5 + $0x10] sm:$0xff]  ;;  %v546_v38 = vld [vmem:[#allocation5 + $0x358] sm:$0xff] }
  0xc3   : > { %937 = vmatpush.msra.mxu3 %v641_v0  ;;  %878 = vmatpush.msra.mxu0 %v445_v3  ;;  %v509_v10 = vld [vmem:[#allocation5 + $0x230] sm:$0xff]  ;;  %v670_v39 = vld [vmem:[#allocation5 + $0x738] sm:$0xff] }
  0xc4   : > { %919 = vmatpush.msra.mxu2 %v569_v4  ;;  %897 = vmatpush.msra.mxu1 %v513_v5  ;;  %v633_v11 = vld [vmem:[#allocation5 + $0x610] sm:$0xff]  ;;  %v474_v40 = vld [vmem:[#allocation5 + $0x118] sm:$0xff] }
  0xc5   : > { %938 = vmatpush.msra.mxu3 %v637_v6  ;;  %920 = vmatmul.f32.vlgmr.msra.gmra.mxu2 %v2711_v62  ;;  %v505_v15 = vld [vmem:[#allocation5 + $0x210] sm:$0xff]  ;;  %v598_v41 = vld [vmem:[#allocation5 + $0x4f8] sm:$0xff] }
  0xc6   : > { %879 = vmatpush.msra.mxu0 %v441_v7  ;;  %984 = vmatpush.msrb.mxu2 %v630_v9  ;;  %v542_v42 = vld [vmem:[#allocation5 + $0x338] sm:$0xff] }
  0xc7   : > { %898 = vmatpush.msra.mxu1 %v509_v10  ;;  %939 = vmatpush.msra.mxu3 %v633_v11  ;;  %v666_v43 = vld [vmem:[#allocation5 + $0x718] sm:$0xff] }
  0xc8   : > { %880 = vmatmul.f32.vlgmr.msra.gmra.mxu0 %v2714_v1  ;;  %940 = vmatmul.f32.vlgmr.msra.gmra.mxu3 %v2717_v2  ;;  %v470_v44 = vld [vmem:[#allocation5 + $0xf8] sm:$0xff] }
  0xc9   : > { %944 = vmatpush.msrb.mxu0 %v502_v12  ;;  %985 = vmatpush.msrb.mxu2 %v626_v13  ;;  %v594_v45 = vld [vmem:[#allocation5 + $0x4d8] sm:$0xff] }
  0xca   : > { %1004 = vmatpush.msrb.mxu3 %v694_v14  ;;  %899 = vmatpush.msra.mxu1 %v505_v15  ;;  %v538_v46 = vld [vmem:[#allocation5 + $0x318] sm:$0xff] }
  0xcb   : > { %945 = vmatpush.msrb.mxu0 %v498_v16  ;;  %900 = vmatmul.f32.vlgmr.msra.gmra.mxu1 %v2723_v8  ;;  %v662_v47 = vld [vmem:[#allocation5 + $0x6f8] sm:$0xff]  ;;  %v1260_v16 = vld [vmem:[#allocation8 + $0x1e0] sm:$0xff] }
  0xcc   : > { %986 = vmatpush.msrb.mxu2 %v622_v17  ;;  %964 = vmatpush.msrb.mxu1 %v566_v18  ;;  %v466_v48 = vld [vmem:[#allocation5 + $0xd8] sm:$0xff]  ;;  %v1256_v17 = vld [vmem:[#allocation8 + $0x1c0] sm:$0xff] }
  0xcd   : > { %1005 = vmatpush.msrb.mxu3 %v690_v19  ;;  %946 = vmatpush.msrb.mxu0 %v494_v20  ;;  %v590_v49 = vld [vmem:[#allocation5 + $0x4b8] sm:$0xff]  ;;  %v1252_v18 = vld [vmem:[#allocation8 + $0x1a0] sm:$0xff] }
  0xce   : > { %987 = vmatpush.msrb.mxu2 %v618_v21  ;;  %965 = vmatpush.msrb.mxu1 %v562_v22  ;;  %v534_v50 = vld [vmem:[#allocation5 + $0x2f8] sm:$0xff]  ;;  %v1248_v19 = vld [vmem:[#allocation8 + $0x180] sm:$0xff] }
  0xcf   : > { %1006 = vmatpush.msrb.mxu3 %v686_v23  ;;  %947 = vmatpush.msrb.mxu0 %v490_v24  ;;  %v658_v51 = vld [vmem:[#allocation5 + $0x6d8] sm:$0xff]  ;;  %v1244_v20 = vld [vmem:[#allocation8 + $0x160] sm:$0xff]  ;;  %v2738_v23 = vld [vmem:[#allocation7] sm:$0xf] }
  0xd0   : > { %988 = vmatpush.msrb.mxu2 %v614_v25  ;;  %966 = vmatpush.msrb.mxu1 %v558_v26  ;;  %v462_v52 = vld [vmem:[#allocation5 + $0xb8] sm:$0xff]  ;;  %v1236_v21 = vld [vmem:[#allocation8 + $0x120] sm:$0xff] }
  0xd1   : > { %1007 = vmatpush.msrb.mxu3 %v682_v27  ;;  %948 = vmatpush.msrb.mxu0 %v486_v28  ;;  %v586_v53 = vld [vmem:[#allocation5 + $0x498] sm:$0xff]  ;;  %v1232_v22 = vld [vmem:[#allocation8 + $0x100] sm:$0xff] }
  0xd2   : > { %989 = vmatpush.msrb.mxu2 %v610_v29  ;;  %967 = vmatpush.msrb.mxu1 %v554_v30  ;;  %v530_v54 = vld [vmem:[#allocation5 + $0x2d8] sm:$0xff]  ;;  %v1220_v24 = vld [vmem:[#allocation8 + $0xa0] sm:$0xff] }
  0xd3   : > { %1008 = vmatpush.msrb.mxu3 %v678_v31  ;;  %949 = vmatpush.msrb.mxu0 %v482_v32  ;;  %v654_v55 = vld [vmem:[#allocation5 + $0x6b8] sm:$0xff]  ;;  %v1216_v25 = vld [vmem:[#allocation8 + $0x80] sm:$0xff] }
  0xd4   : > { %990 = vmatpush.msrb.mxu2 %v606_v33  ;;  %968 = vmatpush.msrb.mxu1 %v550_v34  ;;  %v458_v56 = vld [vmem:[#allocation5 + $0x98] sm:$0xff]  ;;  %v1212_v26 = vld [vmem:[#allocation8 + $0x60] sm:$0xff] }
  0xd5   : > { %1009 = vmatpush.msrb.mxu3 %v674_v35  ;;  %950 = vmatpush.msrb.mxu0 %v478_v36  ;;  %v582_v57 = vld [vmem:[#allocation5 + $0x478] sm:$0xff]  ;;  %v1208_v29 = vld [vmem:[#allocation8 + $0x40] sm:$0xff]  ;;  %v1261_v36 = vld [vmem:[#allocation8 + $0x1e8] sm:$0xff] }
  0xd6   : > { %991 = vmatpush.msrb.mxu2 %v602_v37  ;;  %969 = vmatpush.msrb.mxu1 %v546_v38  ;;  %v526_v58 = vld [vmem:[#allocation5 + $0x2b8] sm:$0xff]  ;;  %v1204_v30 = vld [vmem:[#allocation8 + $0x20] sm:$0xff] }
  0xd7   : > { %1010 = vmatpush.msrb.mxu3 %v670_v39  ;;  %951 = vmatpush.msrb.mxu0 %v474_v40  ;;  %v650_v59 = vld [vmem:[#allocation5 + $0x698] sm:$0xff]  ;;  %v1200_v34 = vld [vmem:[#allocation8] sm:$0xff]  ;;  %v1257_v40 = vld [vmem:[#allocation8 + $0x1c8] sm:$0xff] }
  0xd8   : > { %992 = vmatpush.msrb.mxu2 %v598_v41  ;;  %970 = vmatpush.msrb.mxu1 %v542_v42  ;;  %v454_v60 = vld [vmem:[#allocation5 + $0x78] sm:$0xff]  ;;  %v1324_v35 = vld [vmem:[#allocation8 + $0x3e0] sm:$0xff] }
  0xd9   : > { %1011 = vmatpush.msrb.mxu3 %v666_v43  ;;  %952 = vmatpush.msrb.mxu0 %v470_v44  ;;  %v578_v61 = vld [vmem:[#allocation5 + $0x458] sm:$0xff]  ;;  %v1320_v39 = vld [vmem:[#allocation8 + $0x3c0] sm:$0xff]  ;;  %v1253_v43 = vld [vmem:[#allocation8 + $0x1a8] sm:$0xff] }
  0xda   : > { %993 = vmatpush.msrb.mxu2 %v594_v45  ;;  %971 = vmatpush.msrb.mxu1 %v538_v46  ;;  %v522_v63 = vld [vmem:[#allocation5 + $0x298] sm:$0xff]  ;;  %v1316_v42 = vld [vmem:[#allocation8 + $0x3a0] sm:$0xff]  ;;  %v1249_v46 = vld [vmem:[#allocation8 + $0x188] sm:$0xff] }
  0xdb   : > { %1012 = vmatpush.msrb.mxu3 %v662_v47  ;;  %953 = vmatpush.msrb.mxu0 %v466_v48  ;;  %v646_v0 = vld [vmem:[#allocation5 + $0x678] sm:$0xff]  ;;  %v1312_v45 = vld [vmem:[#allocation8 + $0x380] sm:$0xff] }
  0xdc   : > { %994 = vmatpush.msrb.mxu2 %v590_v49  ;;  %972 = vmatpush.msrb.mxu1 %v534_v50  ;;  %v450_v3 = vld [vmem:[#allocation5 + $0x58] sm:$0xff]  ;;  %v1308_v48 = vld [vmem:[#allocation8 + $0x360] sm:$0xff]  ;;  %v1245_v49 = vld [vmem:[#allocation8 + $0x168] sm:$0xff] }
  0xdd   : > { %1013 = vmatpush.msrb.mxu3 %v658_v51  ;;  %954 = vmatpush.msrb.mxu0 %v462_v52  ;;  %v574_v4 = vld [vmem:[#allocation5 + $0x438] sm:$0xff]  ;;  %v1304_v51 = vld [vmem:[#allocation8 + $0x340] sm:$0xff]  ;;  %v1241_v52 = vld [vmem:[#allocation8 + $0x148] sm:$0xff] }
  0xde   : > { %995 = vmatpush.msrb.mxu2 %v586_v53  ;;  %973 = vmatpush.msrb.mxu1 %v530_v54  ;;  %v518_v5 = vld [vmem:[#allocation5 + $0x278] sm:$0xff] }
  0xdf   : > { %1014 = vmatpush.msrb.mxu3 %v654_v55  ;;  %955 = vmatpush.msrb.mxu0 %v458_v56  ;;  %v642_v6 = vld [vmem:[#allocation5 + $0x658] sm:$0xff]  ;;  %v1300_v55 = vld [vmem:[#allocation8 + $0x320] sm:$0xff]  ;;  %v1237_v56 = vld [vmem:[#allocation8 + $0x128] sm:$0xff] }
  0xe0   : > { %996 = vmatpush.msrb.mxu2 %v582_v57  ;;  %974 = vmatpush.msrb.mxu1 %v526_v58  ;;  %v446_v7 = vld [vmem:[#allocation5 + $0x38] sm:$0xff] }
  0xe1   : > { %1015 = vmatpush.msrb.mxu3 %v650_v59  ;;  %956 = vmatpush.msrb.mxu0 %v454_v60  ;;  %v570_v9 = vld [vmem:[#allocation5 + $0x418] sm:$0xff]  ;;  %v1296_v59 = vld [vmem:[#allocation8 + $0x300] sm:$0xff]  ;;  %v1233_v60 = vld [vmem:[#allocation8 + $0x108] sm:$0xff] }
  0xe2   : > { %997 = vmatpush.msrb.mxu2 %v578_v61  ;;  %975 = vmatpush.msrb.mxu1 %v522_v63  ;;  %v514_v10 = vld [vmem:[#allocation5 + $0x258] sm:$0xff] }
  0xe3   : > { %1016 = vmatpush.msrb.mxu3 %v646_v0  ;;  %957 = vmatpush.msrb.mxu0 %v450_v3  ;;  %v638_v11 = vld [vmem:[#allocation5 + $0x638] sm:$0xff]  ;;  %v1292_v0 = vld [vmem:[#allocation8 + $0x2e0] sm:$0xff]  ;;  %v1229_v3 = vld [vmem:[#allocation8 + $0xe8] sm:$0xff] }
  0xe4   : > { %998 = vmatpush.msrb.mxu2 %v574_v4  ;;  %976 = vmatpush.msrb.mxu1 %v518_v5  ;;  %v442_v12 = vld [vmem:[#allocation5 + $0x18] sm:$0xff]  ;;  %v1288_v5 = vld [vmem:[#allocation8 + $0x2c0] sm:$0xff] }
  0xe5   : > { %1017 = vmatpush.msrb.mxu3 %v642_v6  ;;  %958 = vmatpush.msrb.mxu0 %v446_v7  ;;  %v510_v13 = vld [vmem:[#allocation5 + $0x238] sm:$0xff]  ;;  %v1225_v7 = vld [vmem:[#allocation8 + $0xc8] sm:$0xff] }
  0xe6   : > { %999 = vmatpush.msrb.mxu2 %v570_v9  ;;  %v634_v14 = vld [vmem:[#allocation5 + $0x618] sm:$0xff]  ;;  %977 = vmatpush.msrb.mxu1 %v514_v10  ;;  %v1284_v10 = vld [vmem:[#allocation8 + $0x2a0] sm:$0xff] }
  0xe7   : > { %1018 = vmatpush.msrb.mxu3 %v638_v11  ;;  %1000 = vmatmul.f32.vlgmr.msrb.gmra.mxu2 %v2711_v62  ;;  %v506_v15 = vld [vmem:[#allocation5 + $0x218] sm:$0xff]  ;;  %v1240_v62 = vld [vmem:[#allocation8 + $0x140] sm:$0xff]  ;;  %v1221_v11 = vld [vmem:[#allocation8 + $0xa8] sm:$0xff] }
  0xe8   : > { %959 = vmatpush.msrb.mxu0 %v442_v12  ;;  %978 = vmatpush.msrb.mxu1 %v510_v13  ;;  %v1280_v13 = vld [vmem:[#allocation8 + $0x280] sm:$0xff] }
  0xe9   : > { %1019 = vmatpush.msrb.mxu3 %v634_v14  ;;  %960 = vmatmul.f32.vlgmr.msrb.gmra.mxu0 %v2714_v1  ;;  %v1228_v1 = vld [vmem:[#allocation8 + $0xe0] sm:$0xff] }
  0xea   : > { %1020 = vmatmul.f32.vlgmr.msrb.gmra.mxu3 %v2717_v2  ;;  %979 = vmatpush.msrb.mxu1 %v506_v15  ;;  %v1224_v2 = vld [vmem:[#allocation8 + $0xc0] sm:$0xff]  ;;  %v1217_v15 = vld [vmem:[#allocation8 + $0x88] sm:$0xff] }
  0xeb   : > { %1465 = vmatpush.msra.mxu0 %v1260_v16  ;;  %980 = vmatmul.f32.vlgmr.msrb.gmra.mxu1 %v2723_v8  ;;  %v696_v8 = vperm.slane %v2738_v23, 0 }
  0xec   : > { %1485 = vmatpush.msra.mxu1 %v1324_v35  ;;  %v1321_v35 = vld [vmem:[#allocation8 + $0x3c8] sm:$0xff] }
  0xed   : > { %1466 = vmatpush.msra.mxu0 %v1256_v17  ;;  %v1276_v17 = vld [vmem:[#allocation8 + $0x260] sm:$0xff] }
  0xee   : > { %1486 = vmatpush.msra.mxu1 %v1320_v39  ;;  %v1317_v39 = vld [vmem:[#allocation8 + $0x3a8] sm:$0xff] }
  0xef   : > { %1467 = vmatpush.msra.mxu0 %v1252_v18  ;;  %v1213_v18 = vld [vmem:[#allocation8 + $0x68] sm:$0xff] }
  0xf0   : > { %1487 = vmatpush.msra.mxu1 %v1316_v42 }
  0xf1   : > { %1468 = vmatpush.msra.mxu0 %v1248_v19 }
  0xf2   : > { %1488 = vmatpush.msra.mxu1 %v1312_v45  ;;  %v1313_v45 = vld [vmem:[#allocation8 + $0x388] sm:$0xff] }
  0xf3   : > { %1469 = vmatpush.msra.mxu0 %v1244_v20  ;;  %v697_v20 = vperm.slane %v2738_v23, 1 }
  0xf4   : > { %1489 = vmatpush.msra.mxu1 %v1308_v48 }
  0xf5   : > { %1470 = vmatpush.msra.mxu0 %v1240_v62  ;;  %v1272_v62 = vld [vmem:[#allocation8 + $0x240] sm:$0xff] }
  0xf6   : > { %1490 = vmatpush.msra.mxu1 %v1304_v51  ;;  %v1372_v51 = vld [vmem:[#allocation8 + $0x560] sm:$0xff] }
  0xf7   : > { %1471 = vmatpush.msra.mxu0 %v1236_v21 }
  0xf8   : > { %1491 = vmatpush.msra.mxu1 %v1300_v55 }
  0xf9   : > { %1472 = vmatpush.msra.mxu0 %v1232_v22  ;;  %v1209_v22 = vld [vmem:[#allocation8 + $0x48] sm:$0xff] }
  0xfa   : > { %1492 = vmatpush.msra.mxu1 %v1296_v59 }
  0xfb   : > { %1473 = vmatpush.msra.mxu0 %v1228_v1 }
  0xfc   : > { %1493 = vmatpush.msra.mxu1 %v1292_v0 }
  0xfd   : > { %1474 = vmatpush.msra.mxu0 %v1224_v2  ;;  %v1268_v2 = vld [vmem:[#allocation8 + $0x220] sm:$0xff] }
  0xfe   : > { %1494 = vmatpush.msra.mxu1 %v1288_v5 }
  0xff   : > { %1475 = vmatpush.msra.mxu0 %v1220_v24 }
 0x100   : > { %1495 = vmatpush.msra.mxu1 %v1284_v10 }
 0x101   : > { %v721_v27 = vpop.f32.mrf.mxu0  ;;  %1476 = vmatpush.msra.mxu0 %v1216_v25 }
 0x102   : > { %v722_v28 = vadd.f32 %v721_v27, %v696_v8  ;;  %1496 = vmatpush.msra.mxu1 %v1280_v13  ;;  %v1205_v8 = vld [vmem:[#allocation8 + $0x28] sm:$0xff]  ;;  %v1264_v27 = vld [vmem:[#allocation8 + $0x200] sm:$0xff] }
 0x103   : > { %1477 = vmatpush.msra.mxu0 %v1212_v26  ;;  %v1356_v13 = vld [vmem:[#allocation8 + $0x4e0] sm:$0xff] }
 0x104   : > { %v741_v31 = vpop.f32.mrf.mxu1  ;;  %1497 = vmatpush.msra.mxu1 %v1276_v17 }
 0x105   : > { %1478 = vmatpush.msra.mxu0 %v1208_v29  ;;  %v742_v32 = vadd.f32 %v741_v31, %v722_v28  ;;  %v761_v33 = vpop.f32.mrf.mxu2  ;;  %v1201_v29 = vld [vmem:[#allocation8 + $0x8] sm:$0xff] }
 0x106   : > { %1498 = vmatpush.msra.mxu1 %v1272_v62  ;;  %v1325_v31 = vld [vmem:[#allocation8 + $0x3e8] sm:$0xff] }
 0x107   : > { %1479 = vmatpush.msra.mxu0 %v1204_v30  ;;  %v762_v37 = vadd.f32 %v761_v33, %v742_v32  ;;  %v781_v38 = vpop.f32.mrf.mxu3  ;;  %v1388_v30 = vld [vmem:[#allocation8 + $0x5e0] sm:$0xff] }
 0x108   : > { %1499 = vmatpush.msra.mxu1 %v1268_v2  ;;  %1505 = vmatpush.msra.mxu2 %v1388_v30  ;;  %v1262_v30 = vld [vmem:[#allocation8 + $0x1f0] sm:$0xff] }
 0x109   : > { %1480 = vmatpush.msra.mxu0 %v1200_v34  ;;  %v2741_v41 = vadd.f32 %v781_v38, %v762_v37  ;;  %v1384_v34 = vld [vmem:[#allocation8 + $0x5c0] sm:$0xff] }
 0x10a   : > { %1500 = vmatpush.msra.mxu1 %v1264_v27  ;;  %1506 = vmatpush.msra.mxu2 %v1384_v34  ;;  %v1380_v38 = vld [vmem:[#allocation8 + $0x5a0] sm:$0xff]  ;;  %v1281_v27 = vld [vmem:[#allocation8 + $0x288] sm:$0xff] }
 0x10b   : > { %1545 = vmatpush.msrb.mxu0 %v1261_v36  ;;  %v2744_v44 = vmul.f32 0.70710677, %v2741_v41 }
 0x10c   : > { %1565 = vmatpush.msrb.mxu1 %v1325_v31  ;;  %1507 = vmatpush.msra.mxu2 %v1380_v38  ;;  %v1340_v31 = vld [vmem:[#allocation8 + $0x460] sm:$0xff]  ;;  %v1254_v38 = vld [vmem:[#allocation8 + $0x1b0] sm:$0xff] }
 0x10d   : > { %1546 = vmatpush.msrb.mxu0 %v1257_v40  ;;  %v1032_v47 = vmul.f32 %v2744_v44, %v2744_v44 }
 0x10e   : > { %1566 = vmatpush.msrb.mxu1 %v1321_v35  ;;  %v1336_v35 = vld [vmem:[#allocation8 + $0x440] sm:$0xff] }
 0x10f   : > { %1547 = vmatpush.msrb.mxu0 %v1253_v43  ;;  %v2748_v50 = vmin.f32 %v1032_v47, 16.0  ;;  %v1376_v43 = vld [vmem:[#allocation8 + $0x580] sm:$0xff] }
 0x110   : > { %1567 = vmatpush.msrb.mxu1 %v1317_v39  ;;  %1508 = vmatpush.msra.mxu2 %v1376_v43  ;;  %v1332_v39 = vld [vmem:[#allocation8 + $0x420] sm:$0xff]  ;;  %v698_v43 = vperm.slane %v2738_v23, 2 }
 0x111   : > { %1548 = vmatpush.msrb.mxu0 %v1249_v46  ;;  %v1034_v53 = vmul.f32 2.1237322e-06, %v2748_v50  ;;  %v1045_v54 = vmul.f32 3.8918573e-05, %v2748_v50 }
 0x112   : > { %1568 = vmatpush.msrb.mxu1 %v1313_v45  ;;  %1509 = vmatpush.msra.mxu2 %v1372_v51 }
 0x113   : > { %1549 = vmatpush.msrb.mxu0 %v1245_v49  ;;  %v1035_v57 = vadd.f32 0.00028619796, %v1034_v53  ;;  %v1046_v58 = vadd.f32 0.001143296, %v1045_v54 }
 0x115   : > { %1550 = vmatpush.msrb.mxu0 %v1241_v52  ;;  %v1036_v61 = vmul.f32 %v1035_v57, %v2748_v50  ;;  %v1047_v63 = vmul.f32 %v1046_v58, %v2748_v50  ;;  %v1309_v52 = vld [vmem:[#allocation8 + $0x368] sm:$0xff]  ;;  %v1368_v57 = vld [vmem:[#allocation8 + $0x540] sm:$0xff] }
 0x116   : > { %1569 = vmatpush.msrb.mxu1 %v1309_v52  ;;  %v1305_v58 = vld [vmem:[#allocation8 + $0x348] sm:$0xff]  ;;  %1510 = vmatpush.msra.mxu2 %v1368_v57  ;;  %v1452_v52 = vld [vmem:[#allocation8 + $0x7e0] sm:$0xff] }
 0x117   : > { %1551 = vmatpush.msrb.mxu0 %v1237_v56  ;;  %v1048_v4 = vadd.f32 0.014752088, %v1047_v63  ;;  %v1037_v6 = vadd.f32 0.0036580483, %v1036_v61  ;;  %v1364_v61 = vld [vmem:[#allocation8 + $0x520] sm:$0xff]  ;;  %v1301_v63 = vld [vmem:[#allocation8 + $0x328] sm:$0xff]  ;;  %1525 = vmatpush.msra.mxu3 %v1452_v52 }
 0x118   : > { %1570 = vmatpush.msrb.mxu1 %v1305_v58  ;;  %1511 = vmatpush.msra.mxu2 %v1364_v61  ;;  %v1242_v61 = vld [vmem:[#allocation8 + $0x150] sm:$0xff]  ;;  %v1416_v52 = vld [vmem:[#allocation8 + $0x6c0] sm:$0xff] }
 0x119   : > { %1552 = vmatpush.msrb.mxu0 %v1233_v60  ;;  %v1049_v9 = vmul.f32 %v1048_v4, %v2748_v50  ;;  %v1038_v14 = vmul.f32 %v1037_v6, %v2748_v50  ;;  %v1360_v6 = vld [vmem:[#allocation8 + $0x500] sm:$0xff] }
 0x11a   : > { %1571 = vmatpush.msrb.mxu1 %v1301_v63  ;;  %1512 = vmatpush.msra.mxu2 %v1360_v6  ;;  %v1381_v6 = vld [vmem:[#allocation8 + $0x5a8] sm:$0xff] }
 0x11b   : > { %1553 = vmatpush.msrb.mxu0 %v1229_v3  ;;  %v1050_v12 = vadd.f32 0.112945676, %v1049_v9  ;;  %v1039_v21 = vadd.f32 0.05243302, %v1038_v14  ;;  %v1293_v14 = vld [vmem:[#allocation8 + $0x2e8] sm:$0xff] }
 0x11c   : > { %1513 = vmatpush.msra.mxu2 %v1356_v13 }
 0x11d   : > { %1554 = vmatpush.msrb.mxu0 %v1225_v7  ;;  %v1051_v16 = vmul.f32 %v1050_v12, %v2748_v50  ;;  %v1040_v28 = vmul.f32 %v1039_v21, %v2748_v50  ;;  %v1297_v7 = vld [vmem:[#allocation8 + $0x308] sm:$0xff] }
 0x11e   : > { %1572 = vmatpush.msrb.mxu1 %v1297_v7 }
 0x11f   : > { %1555 = vmatpush.msrb.mxu0 %v1221_v11  ;;  %v1052_v19 = vadd.f32 0.4994258, %v1051_v16  ;;  %v1041_v37 = vadd.f32 0.18741608, %v1040_v28 }
 0x120   : > { %1573 = vmatpush.msrb.mxu1 %v1293_v14 }
 0x121   : > { %1556 = vmatpush.msrb.mxu0 %v1217_v15  ;;  %v1053_v1 = vmul.f32 %v1052_v19, %v2748_v50  ;;  %v1042_v48 = vmul.f32 %v1041_v37, %v2748_v50  ;;  %v1352_v19 = vld [vmem:[#allocation8 + $0x4c0] sm:$0xff] }
 0x122   : > { %1514 = vmatpush.msra.mxu2 %v1352_v19  ;;  %v1373_v19 = vld [vmem:[#allocation8 + $0x568] sm:$0xff] }
 0x123   : > { %1557 = vmatpush.msrb.mxu0 %v1213_v18  ;;  %v801_v24 = vpop.f32.mrf.mxu0  ;;  %v1054_v25 = vadd.f32 1.0, %v1053_v1  ;;  %v1043_v50 = vadd.f32 1.1283791, %v1042_v48  ;;  %v1285_v1 = vld [vmem:[#allocation8 + $0x2a8] sm:$0xff]  ;;  %v1328_v48 = vld [vmem:[#allocation8 + $0x400] sm:$0xff] }
 0x124   : > { %v802_v26 = vadd.f32 %v801_v24, %v697_v20  ;;  %v1289_v20 = vld [vmem:[#allocation8 + $0x2c8] sm:$0xff]  ;;  %v1024_v24 = vmul.f32 0.5, %v2741_v41  ;;  %v1258_v41 = vld [vmem:[#allocation8 + $0x1d0] sm:$0xff] }
 0x125   : > { %1558 = vmatpush.msrb.mxu0 %v1209_v22  ;;  %2239 = vrcp.f32 %v1054_v25  ;;  %v1066_v53 = vand.u32 2147483648, %v1054_v25  ;;  %vm1060_vm0 = vweird.f32 %v1054_v25  ;;  %v1064_v56 = vand.u32 2147483647, %v1054_v25  ;;  %1574 = vmatpush.msrb.mxu1 %v1289_v20  ;;  %v1348_v22 = vld [vmem:[#allocation8 + $0x4a0] sm:$0xff] }
 0x126   : > { %v821_v32 = vpop.f32.mrf.mxu1  ;;  %v841_v33 = vpop.f32.mrf.mxu2  ;;  %v1044_v11 = vmul.f32 %v1043_v50, %v2744_v44  ;;  %1515 = vmatpush.msra.mxu2 %v1348_v22  ;;  %v1385_v50 = vld [vmem:[#allocation8 + $0x5c8] sm:$0xff] }
 0x127   : > { %1559 = vmatpush.msrb.mxu0 %v1205_v8  ;;  %v822_v36 = vadd.f32 %v821_v32, %v802_v26  ;;  %v1067_v3 = vor.u32 1.1754944e-38, %v1066_v53  ;;  %vm1065_vm3 = vcmp.eq.f32.partialorder %v1064_v56, 8.507059e+37  ;;  %1575 = vmatpush.msrb.mxu1 %v1285_v1  ;;  %v1344_v26 = vld [vmem:[#allocation8 + $0x480] sm:$0xff]  ;;  %v1277_v32 = vld [vmem:[#allocation8 + $0x268] sm:$0xff]  ;;  %v1246_v56 = vld [vmem:[#allocation8 + $0x170] sm:$0xff] }
 0x128   : > { %1516 = vmatpush.msra.mxu2 %v1344_v26  ;;  %v1389_v53 = vld [vmem:[#allocation8 + $0x5e8] sm:$0xff]  ;;  %v1432_v1 = vld [vmem:[#allocation8 + $0x740] sm:$0xff] }
 0x129   : > { %1560 = vmatpush.msrb.mxu0 %v1201_v29  ;;  %v842_v40 = vadd.f32 %v841_v33, %v822_v36  ;;  %v861_v42 = vpop.f32.mrf.mxu3  ;;  %1576 = vmatpush.msrb.mxu1 %v1281_v27  ;;  %v1273_v36 = vld [vmem:[#allocation8 + $0x248] sm:$0xff]  ;;  %v1428_v26 = vld [vmem:[#allocation8 + $0x720] sm:$0xff] }
 0x12a   : > { %1517 = vmatpush.msra.mxu2 %v1340_v31  ;;  %v1365_v27 = vld [vmem:[#allocation8 + $0x528] sm:$0xff]  ;;  %v1218_v31 = vld [vmem:[#allocation8 + $0x90] sm:$0xff] }
 0x12b   : > { %v2240_v46 = vpop.eup %2239  ;;  %v2760_v47 = vadd.f32 %v861_v42, %v842_v40  ;;  %1577 = vmatpush.msrb.mxu1 %v1277_v32  ;;  %v1269_v40 = vld [vmem:[#allocation8 + $0x228] sm:$0xff]  ;;  %v1310_v32 = vld [vmem:[#allocation8 + $0x370] sm:$0xff] }
 0x12c   : > { %v1056_v49 = vmul.f32 %v2240_v46, %v1054_v25  ;;  %vm1061_vm1 = vweird.f32 %v2240_v46  ;;  %1518 = vmatpush.msra.mxu2 %v1336_v35  ;;  %v1361_v35 = vld [vmem:[#allocation8 + $0x508] sm:$0xff] }
 0x12d   : > { %v2764_v54 = vmul.f32 0.70710677, %v2760_v47  ;;  %vm2768_vm2 = vmor %vm1060_vm0, %vm1061_vm1  ;;  %1578 = vmatpush.msrb.mxu1 %v1273_v36 }
 0x12e   : > { %v1057_v55 = vsub.f32 1.0, %v1056_v49  ;;  %1519 = vmatpush.msra.mxu2 %v1332_v39  ;;  %v1265_v49 = vld [vmem:[#allocation8 + $0x208] sm:$0xff] }
 0x12f   : > { %v1072_v59 = vmul.f32 %v2764_v54, %v2764_v54  ;;  %1579 = vmatpush.msrb.mxu1 %v1269_v40  ;;  %v1420_v40 = vld [vmem:[#allocation8 + $0x6e0] sm:$0xff] }
 0x130   : > { %v1058_v60 = vmul.f32 %v2240_v46, %v1057_v55  ;;  %1520 = vmatpush.msra.mxu2 %v1328_v48 }
 0x131   : > { %v2772_v4 = vmin.f32 %v1072_v59, 16.0  ;;  %1580 = vmatpush.msrb.mxu1 %v1265_v49  ;;  %v1448_v59 = vld [vmem:[#allocation8 + $0x7c0] sm:$0xff] }
 0x132   : > { %v1059_v5 = vadd.f32 %v2240_v46, %v1058_v60  ;;  %1585 = vmatpush.msrb.mxu2 %v1389_v53  ;;  %1526 = vmatpush.msra.mxu3 %v1448_v59  ;;  %v1353_v53 = vld [vmem:[#allocation8 + $0x4c8] sm:$0xff] }
 0x133   : > { %v1074_v9 = vmul.f32 2.1237322e-06, %v2772_v4  ;;  %v1085_v10 = vmul.f32 3.8918573e-05, %v2772_v4  ;;  %v1349_v59 = vld [vmem:[#allocation8 + $0x4a8] sm:$0xff] }
 0x134   : > { %v1063_v12 = vsel %vm2768_vm2, %v2240_v46, %v1059_v5  ;;  %v1250_v46 = vld [vmem:[#allocation8 + $0x190] sm:$0xff]  ;;  %1586 = vmatpush.msrb.mxu2 %v1385_v50  ;;  %v1444_v5 = vld [vmem:[#allocation8 + $0x7a0] sm:$0xff] }
 0x135   : > { %v1068_v15 = vsel %vm1065_vm3, %v1067_v3, %v1063_v12  ;;  %v1075_v16 = vadd.f32 0.00028619796, %v1074_v9  ;;  %v1086_v17 = vadd.f32 0.001143296, %v1085_v10  ;;  %v1238_v3 = vld [vmem:[#allocation8 + $0x130] sm:$0xff]  ;;  %1527 = vmatpush.msra.mxu3 %v1444_v5  ;;  %v1377_v12 = vld [vmem:[#allocation8 + $0x588] sm:$0xff] }
 0x136   : > { %v1069_v18 = vmul.f32 %v1068_v15, %v1044_v11  ;;  %v1234_v10 = vld [vmem:[#allocation8 + $0x110] sm:$0xff]  ;;  %1587 = vmatpush.msrb.mxu2 %v1381_v6  ;;  %v1440_v11 = vld [vmem:[#allocation8 + $0x780] sm:$0xff]  ;;  %v1025_v5 = vmul.f32 0.5, %v2760_v47 }
 0x137   : > { %v1076_v62 = vmul.f32 %v1075_v16, %v2772_v4  ;;  %v1087_v21 = vmul.f32 %v1086_v17, %v2772_v4  ;;  %1528 = vmatpush.msra.mxu3 %v1440_v11  ;;  %v1230_v15 = vld [vmem:[#allocation8 + $0xf0] sm:$0xff]  ;;  %v1341_v11 = vld [vmem:[#allocation8 + $0x468] sm:$0xff]  ;;  %v1400_v47 = vld [vmem:[#allocation8 + $0x640] sm:$0xff] }
 0x138   : > { %v2125_v44 = vclamps-f32 %v1069_v18, 1.0  ;;  %1588 = vmatpush.msrb.mxu2 %v1377_v12  ;;  %v1436_v18 = vld [vmem:[#allocation8 + $0x760] sm:$0xff] }
 0x139   : > { %v1088_v2 = vadd.f32 0.014752088, %v1087_v21  ;;  %v1077_v25 = vadd.f32 0.0036580483, %v1076_v62  ;;  %v1226_v21 = vld [vmem:[#allocation8 + $0xd0] sm:$0xff]  ;;  %1529 = vmatpush.msra.mxu3 %v1436_v18  ;;  %v1337_v18 = vld [vmem:[#allocation8 + $0x448] sm:$0xff] }
 0x13a   : > { %v1192_v8 = vadd.f32 1.0, %v2125_v44  ;;  %1589 = vmatpush.msrb.mxu2 %v1373_v19  ;;  %v1322_v19 = vld [vmem:[#allocation8 + $0x3d0] sm:$0xff] }
 0x13b   : > { %v1089_v28 = vmul.f32 %v1088_v2, %v2772_v4  ;;  %v1078_v34 = vmul.f32 %v1077_v25, %v2772_v4  ;;  %v1369_v2 = vld [vmem:[#allocation8 + $0x548] sm:$0xff]  ;;  %1530 = vmatpush.msra.mxu3 %v1432_v1  ;;  %v699_v1 = vperm.slane %v2738_v23, 3 }
 0x13c   : > { %v2783_v29 = vmul.f32 %v1192_v8, %v1024_v24  ;;  %1590 = vmatpush.msrb.mxu2 %v1369_v2  ;;  %v1318_v2 = vld [vmem:[#allocation8 + $0x3b0] sm:$0xff] }
 0x13d   : > { %v1090_v33 = vadd.f32 0.112945676, %v1089_v28  ;;  %v1079_v45 = vadd.f32 0.05243302, %v1078_v34  ;;  %1531 = vmatpush.msra.mxu3 %v1428_v26  ;;  %v1329_v26 = vld [vmem:[#allocation8 + $0x408] sm:$0xff] }
 0x13e   : > { %1481 = vmatmul.f32.vlgmr.msra.gmra.mxu0 %v2783_v29  ;;  %1591 = vmatpush.msrb.mxu2 %v1365_v27  ;;  %v1314_v27 = vld [vmem:[#allocation8 + $0x390] sm:$0xff] }
 0x13f   : > { %v1091_v37 = vmul.f32 %v1090_v33, %v2772_v4  ;;  %1625 = vmatpush.msra.mxu0 %v1262_v30  ;;  %v1080_v60 = vmul.f32 %v1079_v45, %v2772_v4 }
 0x140   : > { %1592 = vmatpush.msrb.mxu2 %v1361_v35 }
 0x141   : > { %v1092_v42 = vadd.f32 0.4994258, %v1091_v37  ;;  %1626 = vmatpush.msra.mxu0 %v1258_v41  ;;  %v1081_v9 = vadd.f32 0.18741608, %v1080_v60  ;;  %v1424_v41 = vld [vmem:[#allocation8 + $0x700] sm:$0xff]  ;;  %v1214_v37 = vld [vmem:[#allocation8 + $0x70] sm:$0xff] }
 0x142   : > { %1532 = vmatpush.msra.mxu3 %v1424_v41  ;;  %v1202_v60 = vld [vmem:[#allocation8 + $0x10] sm:$0xff]  ;;  %v1449_v41 = vld [vmem:[#allocation8 + $0x7c8] sm:$0xff] }
 0x143   : > { %v1093_v51 = vmul.f32 %v1092_v42, %v2772_v4  ;;  %1627 = vmatpush.msra.mxu0 %v1254_v38  ;;  %v1082_v20 = vmul.f32 %v1081_v9, %v2772_v4  ;;  %v1222_v4 = vld [vmem:[#allocation8 + $0xb0] sm:$0xff]  ;;  %v1357_v42 = vld [vmem:[#allocation8 + $0x4e8] sm:$0xff] }
 0x144   : > { %1533 = vmatpush.msra.mxu3 %v1420_v40  ;;  %1593 = vmatpush.msrb.mxu2 %v1357_v42  ;;  %v1239_v40 = vld [vmem:[#allocation8 + $0x138] sm:$0xff]  ;;  %v1445_v42 = vld [vmem:[#allocation8 + $0x7a8] sm:$0xff] }
 0x145   : > { %v881_v55 = vpop.f32.mrf.mxu0  ;;  %v2790_v57 = vadd.f32 1.0, %v1093_v51  ;;  %1628 = vmatpush.msra.mxu0 %v1250_v46  ;;  %v1083_v28 = vadd.f32 1.1283791, %v1082_v20  ;;  %v1210_v46 = vld [vmem:[#allocation8 + $0x50] sm:$0xff]  ;;  %v1255_v20 = vld [vmem:[#allocation8 + $0x1b8] sm:$0xff] }
 0x146   : > { %v882_v58 = vadd.f32 %v881_v55, %v698_v43  ;;  %1561 = vmatmul.f32.vlgmr.msrb.gmra.mxu0 %v2783_v29  ;;  %1534 = vmatpush.msra.mxu3 %v1416_v52 }
 0x147   : > { %2241 = vrcp.f32 %v2790_v57  ;;  %1629 = vmatpush.msra.mxu0 %v1246_v56  ;;  %v1106_v44 = vand.u32 2147483648, %v2790_v57  ;;  %vm1100_vm4 = vweird.f32 %v2790_v57  ;;  %v1104_v8 = vand.u32 2147483647, %v2790_v57  ;;  %v1206_v56 = vld [vmem:[#allocation8 + $0x30] sm:$0xff]  ;;  %1594 = vmatpush.msrb.mxu2 %v1353_v53 }
 0x148   : > { %v901_v63 = vpop.f32.mrf.mxu1  ;;  %v921_v0 = vpop.f32.mrf.mxu2  ;;  %v1084_v43 = vmul.f32 %v1083_v28, %v2764_v54  ;;  %v1247_v28 = vld [vmem:[#allocation8 + $0x178] sm:$0xff] }
 0x149   : > { %v902_v7 = vadd.f32 %v901_v63, %v882_v58  ;;  %1630 = vmatpush.msra.mxu0 %v1242_v61  ;;  %v1107_v33 = vor.u32 1.1754944e-38, %v1106_v44  ;;  %vm1105_vm7 = vcmp.eq.f32.partialorder %v1104_v8, 8.507059e+37  ;;  %v1412_v58 = vld [vmem:[#allocation8 + $0x6a0] sm:$0xff]  ;;  %1595 = vmatpush.msrb.mxu2 %v1349_v59  ;;  %v1333_v44 = vld [vmem:[#allocation8 + $0x428] sm:$0xff]  ;;  %v1227_v59 = vld [vmem:[#allocation8 + $0xd8] sm:$0xff] }
 0x14a   : > { %1535 = vmatpush.msra.mxu3 %v1412_v58  ;;  %v1294_v58 = vld [vmem:[#allocation8 + $0x2f0] sm:$0xff] }
 0x14b   : > { %v922_v13 = vadd.f32 %v921_v0, %v902_v7  ;;  %v941_v14 = vpop.f32.mrf.mxu3  ;;  %1631 = vmatpush.msra.mxu0 %v1238_v3  ;;  %v1408_v0 = vld [vmem:[#allocation8 + $0x680] sm:$0xff]  ;;  %v1345_v3 = vld [vmem:[#allocation8 + $0x488] sm:$0xff]  ;;  %v1263_v7 = vld [vmem:[#allocation8 + $0x1f8] sm:$0xff] }
 0x14c   : > { %1536 = vmatpush.msra.mxu3 %v1408_v0  ;;  %1596 = vmatpush.msrb.mxu2 %v1345_v3  ;;  %v1290_v3 = vld [vmem:[#allocation8 + $0x2d0] sm:$0xff] }
 0x14d   : > { %v2242_v16 = vpop.eup %2241  ;;  %v2795_v17 = vadd.f32 %v941_v14, %v922_v13  ;;  %1632 = vmatpush.msra.mxu0 %v1234_v10  ;;  %v1404_v10 = vld [vmem:[#allocation8 + $0x660] sm:$0xff]  ;;  %v1326_v13 = vld [vmem:[#allocation8 + $0x3f0] sm:$0xff]  ;;  %v1259_v14 = vld [vmem:[#allocation8 + $0x1d8] sm:$0xff] }
 0x14e   : > { %v1096_v62 = vmul.f32 %v2242_v16, %v2790_v57  ;;  %vm1101_vm5 = vweird.f32 %v2242_v16  ;;  %1537 = vmatpush.msra.mxu3 %v1404_v10  ;;  %1597 = vmatpush.msrb.mxu2 %v1341_v11  ;;  %v1286_v10 = vld [vmem:[#allocation8 + $0x2b0] sm:$0xff]  ;;  %v1219_v11 = vld [vmem:[#allocation8 + $0x98] sm:$0xff] }
 0x14f   : > { %v2801_v22 = vmul.f32 0.70710677, %v2795_v17  ;;  %1633 = vmatpush.msra.mxu0 %v1230_v15  ;;  %vm2809_vm6 = vmor %vm1100_vm4, %vm1101_vm5 }
 0x150   : > { %v1097_v24 = vsub.f32 1.0, %v1096_v62  ;;  %1538 = vmatpush.msra.mxu3 %v1400_v47  ;;  %1598 = vmatpush.msrb.mxu2 %v1337_v18  ;;  %v1282_v18 = vld [vmem:[#allocation8 + $0x290] sm:$0xff] }
 0x151   : > { %v1112_v25 = vmul.f32 %v2801_v22, %v2801_v22  ;;  %1634 = vmatpush.msra.mxu0 %v1226_v21  ;;  %v1396_v21 = vld [vmem:[#allocation8 + $0x620] sm:$0xff] }
 0x152   : > { %v1098_v30 = vmul.f32 %v2242_v16, %v1097_v24  ;;  %v1251_v24 = vld [vmem:[#allocation8 + $0x198] sm:$0xff]  ;;  %1539 = vmatpush.msra.mxu3 %v1396_v21  ;;  %1599 = vmatpush.msrb.mxu2 %v1333_v44 }
 0x153   : > { %v2813_v34 = vmin.f32 %v1112_v25, 16.0  ;;  %1635 = vmatpush.msra.mxu0 %v1222_v4  ;;  %v1392_v25 = vld [vmem:[#allocation8 + $0x600] sm:$0xff] }
 0x154   : > { %v1099_v36 = vadd.f32 %v2242_v16, %v1098_v30  ;;  %1540 = vmatpush.msra.mxu3 %v1392_v25  ;;  %v1453_v30 = vld [vmem:[#allocation8 + $0x7e8] sm:$0xff]  ;;  %1600 = vmatpush.msrb.mxu2 %v1329_v26  ;;  %v1274_v25 = vld [vmem:[#allocation8 + $0x250] sm:$0xff]  ;;  %v1207_v26 = vld [vmem:[#allocation8 + $0x38] sm:$0xff] }
 0x155   : > { %v1114_v38 = vmul.f32 2.1237322e-06, %v2813_v34  ;;  %v1125_v39 = vmul.f32 3.8918573e-05, %v2813_v34  ;;  %1636 = vmatpush.msra.mxu0 %v1218_v31 }
 0x156   : > { %v1103_v45 = vsel %vm2809_vm6, %v2242_v16, %v1099_v36  ;;  %1605 = vmatpush.msrb.mxu3 %v1453_v30 }
 0x157   : > { %v1108_v48 = vsel %vm1105_vm7, %v1107_v33, %v1103_v45  ;;  %v1115_v49 = vadd.f32 0.00028619796, %v1114_v38  ;;  %v1126_v51 = vadd.f32 0.001143296, %v1125_v39  ;;  %1637 = vmatpush.msra.mxu0 %v1214_v37  ;;  %v1243_v33 = vld [vmem:[#allocation8 + $0x158] sm:$0xff]  ;;  %v1306_v39 = vld [vmem:[#allocation8 + $0x350] sm:$0xff] }
 0x158   : > { %v1109_v55 = vmul.f32 %v1108_v48, %v1084_v43  ;;  %1606 = vmatpush.msrb.mxu3 %v1449_v41  ;;  %v1235_v48 = vld [vmem:[#allocation8 + $0x118] sm:$0xff]  ;;  %v1270_v41 = vld [vmem:[#allocation8 + $0x230] sm:$0xff] }
 0x159   : > { %v1116_v57 = vmul.f32 %v1115_v49, %v2813_v34  ;;  %v1127_v54 = vmul.f32 %v1126_v51, %v2813_v34  ;;  %1638 = vmatpush.msra.mxu0 %v1210_v46  ;;  %v1302_v46 = vld [vmem:[#allocation8 + $0x330] sm:$0xff]  ;;  %v1441_v49 = vld [vmem:[#allocation8 + $0x788] sm:$0xff] }
 0x15a   : > { %v2126_v50 = vclamps-f32 %v1109_v55, 1.0  ;;  %1607 = vmatpush.msrb.mxu3 %v1445_v42  ;;  %v1298_v55 = vld [vmem:[#allocation8 + $0x310] sm:$0xff] }
 0x15b   : > { %v1117_v61 = vadd.f32 0.0036580483, %v1116_v57  ;;  %v1128_v63 = vadd.f32 0.014752088, %v1127_v54  ;;  %1639 = vmatpush.msra.mxu0 %v1206_v56  ;;  %v1231_v56 = vld [vmem:[#allocation8 + $0xf8] sm:$0xff]  ;;  %v1437_v57 = vld [vmem:[#allocation8 + $0x768] sm:$0xff] }
 0x15c   : > { %v1193_v6 = vadd.f32 1.0, %v2126_v50  ;;  %1608 = vmatpush.msrb.mxu3 %v1441_v49  ;;  %v1433_v50 = vld [vmem:[#allocation8 + $0x748] sm:$0xff] }
 0x15d   : > { %v1129_v9 = vmul.f32 %v1128_v63, %v2813_v34  ;;  %1640 = vmatpush.msra.mxu0 %v1202_v60  ;;  %v1118_v15 = vmul.f32 %v1117_v61, %v2813_v34  ;;  %v1401_v49 = vld [vmem:[#allocation8 + $0x648] sm:$0xff] }
 0x15e   : > { %v2824_v12 = vmul.f32 %v1193_v6, %v1025_v5  ;;  %1641 = vmatmul.f32.vlgmr.msra.gmra.mxu0 %v2783_v29  ;;  %1609 = vmatpush.msrb.mxu3 %v1437_v57  ;;  %v1223_v5 = vld [vmem:[#allocation8 + $0xb8] sm:$0xff]  ;;  %v1429_v6 = vld [vmem:[#allocation8 + $0x728] sm:$0xff] }
 0x15f   : > { %v1130_v16 = vadd.f32 0.112945676, %v1129_v9  ;;  %1705 = vmatpush.msrb.mxu0 %v1263_v7  ;;  %v1119_v8 = vadd.f32 0.05243302, %v1118_v15  ;;  %v1393_v57 = vld [vmem:[#allocation8 + $0x608] sm:$0xff] }
 0x160   : > { %1501 = vmatmul.f32.vlgmr.msra.gmra.mxu1 %v2824_v12  ;;  %1610 = vmatpush.msrb.mxu3 %v1433_v50 }
 0x161   : > { %v1131_v62 = vmul.f32 %v1130_v16, %v2813_v34  ;;  %1645 = vmatpush.msra.mxu1 %v1326_v13  ;;  %1706 = vmatpush.msrb.mxu0 %v1259_v14  ;;  %v1120_v35 = vmul.f32 %v1119_v8, %v2813_v34 }
 0x162   : > { %1611 = vmatpush.msrb.mxu3 %v1429_v6  ;;  %v1311_v6 = vld [vmem:[#allocation8 + $0x378] sm:$0xff] }
 0x163   : > { %v1132_v4 = vadd.f32 0.4994258, %v1131_v62  ;;  %1646 = vmatpush.msra.mxu1 %v1322_v19  ;;  %1707 = vmatpush.msrb.mxu0 %v1255_v20  ;;  %v1121_v51 = vadd.f32 0.18741608, %v1120_v35  ;;  %v1215_v19 = vld [vmem:[#allocation8 + $0x78] sm:$0xff]  ;;  %v1421_v20 = vld [vmem:[#allocation8 + $0x6e8] sm:$0xff] }
 0x164   : > { %v1278_v62 = vld [vmem:[#allocation8 + $0x270] sm:$0xff]  ;;  %v1203_v35 = vld [vmem:[#allocation8 + $0x18] sm:$0xff] }
 0x165   : > { %v1133_v31 = vmul.f32 %v1132_v4, %v2813_v34  ;;  %1647 = vmatpush.msra.mxu1 %v1318_v2  ;;  %1708 = vmatpush.msrb.mxu0 %v1251_v24  ;;  %v1122_v61 = vmul.f32 %v1121_v51, %v2813_v34  ;;  %v1425_v34 = vld [vmem:[#allocation8 + $0x708] sm:$0xff]  ;;  %v1211_v2 = vld [vmem:[#allocation8 + $0x58] sm:$0xff] }
 0x166   : > { %v961_v23 = vpop.f32.mrf.mxu0  ;;  %1612 = vmatpush.msrb.mxu3 %v1425_v34  ;;  %v1417_v24 = vld [vmem:[#allocation8 + $0x6c8] sm:$0xff]  ;;  %v1370_v34 = vld [vmem:[#allocation8 + $0x550] sm:$0xff] }
 0x167   : > { %v2833_v36 = vadd.f32 1.0, %v1133_v31  ;;  %v962_v37 = vadd.f32 %v961_v23, %v699_v1  ;;  %1648 = vmatpush.msra.mxu1 %v1314_v27  ;;  %1709 = vmatpush.msrb.mxu0 %v1247_v28  ;;  %v1123_v13 = vadd.f32 1.1283791, %v1122_v61  ;;  %v1413_v31 = vld [vmem:[#allocation8 + $0x6a8] sm:$0xff]  ;;  %v1315_v61 = vld [vmem:[#allocation8 + $0x398] sm:$0xff] }
 0x168   : > { %v981_v38 = vpop.f32.mrf.mxu1  ;;  %1581 = vmatmul.f32.vlgmr.msrb.gmra.mxu1 %v2824_v12  ;;  %1613 = vmatpush.msrb.mxu3 %v1421_v20 }
 0x169   : > { %2243 = vrcp.f32 %v2833_v36  ;;  %1649 = vmatpush.msra.mxu1 %v1310_v32  ;;  %1710 = vmatpush.msrb.mxu0 %v1243_v33  ;;  %v982_v43 = vadd.f32 %v981_v38, %v962_v37  ;;  %vm1140_vm8 = vweird.f32 %v2833_v36  ;;  %v1146_v14 = vand.u32 2147483648, %v2833_v36 }
 0x16a   : > { %v1001_v45 = vpop.f32.mrf.mxu2  ;;  %v1144_v16 = vand.u32 2147483647, %v2833_v36  ;;  %v1124_v8 = vmul.f32 %v1123_v13, %v2801_v22  ;;  %1614 = vmatpush.msrb.mxu3 %v1417_v24  ;;  %v1303_v13 = vld [vmem:[#allocation8 + $0x338] sm:$0xff] }
 0x16b   : > { %1650 = vmatpush.msra.mxu1 %v1306_v39  ;;  %1711 = vmatpush.msrb.mxu0 %v1239_v40  ;;  %v1002_v52 = vadd.f32 %v1001_v45, %v982_v43  ;;  %v1147_v4 = vor.u32 1.1754944e-38, %v1146_v14  ;;  %v1266_v39 = vld [vmem:[#allocation8 + $0x210] sm:$0xff]  ;;  %v1405_v40 = vld [vmem:[#allocation8 + $0x668] sm:$0xff]  ;;  %v1026_v43 = vmul.f32 0.5, %v2795_v17  ;;  %v1287_v24 = vld [vmem:[#allocation8 + $0x2b8] sm:$0xff] }
 0x16c   : > { %vm1145_vm11 = vcmp.eq.f32.partialorder %v1144_v16, 8.507059e+37  ;;  %1615 = vmatpush.msrb.mxu3 %v1413_v31  ;;  %v1366_v14 = vld [vmem:[#allocation8 + $0x530] sm:$0xff] }
 0x16d   : > { %v1021_v53 = vpop.f32.mrf.mxu3  ;;  %1651 = vmatpush.msra.mxu1 %v1302_v46  ;;  %1712 = vmatpush.msrb.mxu0 %v1235_v48  ;;  %v1327_v48 = vld [vmem:[#allocation8 + $0x3f8] sm:$0xff]  ;;  %v1346_v31 = vld [vmem:[#allocation8 + $0x490] sm:$0xff] }
 0x16e   : > { %v2837_v54 = vadd.f32 %v1021_v53, %v1002_v52  ;;  %v1390_v53 = vld [vmem:[#allocation8 + $0x5f0] sm:$0xff] }
 0x16f   : > { %v2244_v60 = vpop.eup %2243  ;;  %1652 = vmatpush.msra.mxu1 %v1298_v55  ;;  %1713 = vmatpush.msrb.mxu0 %v1231_v56  ;;  %v1323_v55 = vld [vmem:[#allocation8 + $0x3d8] sm:$0xff]  ;;  %v1397_v56 = vld [vmem:[#allocation8 + $0x628] sm:$0xff] }
 0x170   : > { %v1136_v63 = vmul.f32 %v2244_v60, %v2833_v36  ;;  %v2842_v0 = vmul.f32 0.70710677, %v2837_v54  ;;  %vm1141_vm9 = vweird.f32 %v2244_v60  ;;  %v1409_v36 = vld [vmem:[#allocation8 + $0x688] sm:$0xff] }
 0x171   : > { %1653 = vmatpush.msra.mxu1 %v1294_v58  ;;  %1714 = vmatpush.msrb.mxu0 %v1227_v59  ;;  %vm1142_vm10 = vmor %vm1140_vm8, %vm1141_vm9  ;;  %v1319_v59 = vld [vmem:[#allocation8 + $0x3b8] sm:$0xff] }
 0x172   : > { %v1137_v7 = vsub.f32 1.0, %v1136_v63  ;;  %v1152_v9 = vmul.f32 %v2842_v0, %v2842_v0  ;;  %1616 = vmatpush.msrb.mxu3 %v1409_v36 }
 0x173   : > { %1654 = vmatpush.msra.mxu1 %v1290_v3  ;;  %1715 = vmatpush.msrb.mxu0 %v1223_v5  ;;  %v1378_v5 = vld [vmem:[#allocation8 + $0x590] sm:$0xff] }
 0x174   : > { %v1138_v15 = vmul.f32 %v2244_v60, %v1137_v7  ;;  %v2849_v47 = vmin.f32 %v1152_v9, 16.0  ;;  %1617 = vmatpush.msrb.mxu3 %v1405_v40  ;;  %v1374_v9 = vld [vmem:[#allocation8 + $0x570] sm:$0xff] }
 0x175   : > { %1655 = vmatpush.msra.mxu1 %v1286_v10  ;;  %1716 = vmatpush.msrb.mxu0 %v1219_v11  ;;  %v1307_v10 = vld [vmem:[#allocation8 + $0x358] sm:$0xff]  ;;  %v1334_v40 = vld [vmem:[#allocation8 + $0x430] sm:$0xff] }
 0x176   : > { %v1139_v21 = vadd.f32 %v2244_v60, %v1138_v15  ;;  %v1154_v44 = vmul.f32 2.1237322e-06, %v2849_v47  ;;  %v1165_v1 = vmul.f32 3.8918573e-05, %v2849_v47  ;;  %1618 = vmatpush.msrb.mxu3 %v1401_v49  ;;  %v1299_v15 = vld [vmem:[#allocation8 + $0x318] sm:$0xff] }
 0x177   : > { %1656 = vmatpush.msra.mxu1 %v1282_v18  ;;  %1717 = vmatpush.msrb.mxu0 %v1215_v19  ;;  %v1362_v18 = vld [vmem:[#allocation8 + $0x510] sm:$0xff]  ;;  %v1295_v19 = vld [vmem:[#allocation8 + $0x2f8] sm:$0xff] }
 0x178   : > { %v1143_v27 = vsel %vm1142_vm10, %v2244_v60, %v1139_v21  ;;  %v1155_v28 = vadd.f32 0.00028619796, %v1154_v44  ;;  %v1166_v30 = vadd.f32 0.001143296, %v1165_v1  ;;  %1619 = vmatpush.msrb.mxu3 %v1397_v56  ;;  %v1382_v60 = vld [vmem:[#allocation8 + $0x5b0] sm:$0xff]  ;;  %v1291_v21 = vld [vmem:[#allocation8 + $0x2d8] sm:$0xff] }
 0x179   : > { %v1148_v23 = vsel %vm1145_vm11, %v1147_v4, %v1143_v27  ;;  %1657 = vmatpush.msra.mxu1 %v1278_v62  ;;  %1718 = vmatpush.msrb.mxu0 %v1211_v2  ;;  %v1358_v62 = vld [vmem:[#allocation8 + $0x4f0] sm:$0xff]  ;;  %v1383_v56 = vld [vmem:[#allocation8 + $0x5b8] sm:$0xff] }
 0x17a   : > { %v1149_v32 = vmul.f32 %v1148_v23, %v1124_v8  ;;  %v1156_v22 = vmul.f32 %v1155_v28, %v2849_v47  ;;  %v1167_v33 = vmul.f32 %v1166_v30, %v2849_v47  ;;  %1620 = vmatpush.msrb.mxu3 %v1393_v57  ;;  %v1354_v2 = vld [vmem:[#allocation8 + $0x4d0] sm:$0xff]  ;;  %v1279_v23 = vld [vmem:[#allocation8 + $0x278] sm:$0xff] }
 0x17b   : > { %1658 = vmatpush.msra.mxu1 %v1274_v25  ;;  %1719 = vmatpush.msrb.mxu0 %v1207_v26  ;;  %v1350_v25 = vld [vmem:[#allocation8 + $0x4b0] sm:$0xff]  ;;  %v1283_v26 = vld [vmem:[#allocation8 + $0x298] sm:$0xff] }
 0x17c   : > { %v2127_v37 = vclamps-f32 %v1149_v32, 1.0  ;;  %v1168_v38 = vadd.f32 0.014752088, %v1167_v33  ;;  %v1157_v42 = vadd.f32 0.0036580483, %v1156_v22  ;;  %v1342_v22 = vld [vmem:[#allocation8 + $0x470] sm:$0xff] }
 0x17d   : > { %1659 = vmatpush.msra.mxu1 %v1270_v41  ;;  %1720 = vmatpush.msrb.mxu0 %v1203_v35  ;;  %v1275_v33 = vld [vmem:[#allocation8 + $0x258] sm:$0xff] }
 0x17e   : > { %v1194_v45 = vadd.f32 1.0, %v2127_v37  ;;  %v1169_v46 = vmul.f32 %v1168_v38, %v2849_v47  ;;  %1721 = vmatmul.f32.vlgmr.msrb.gmra.mxu0 %v2783_v29  ;;  %v1158_v17 = vmul.f32 %v1157_v42, %v2849_v47  ;;  %v1386_v29 = vld [vmem:[#allocation8 + $0x5d0] sm:$0xff]  ;;  %v1271_v38 = vld [vmem:[#allocation8 + $0x238] sm:$0xff] }
 0x17f   : > { %1660 = vmatpush.msra.mxu1 %v1266_v39  ;;  %v1338_v37 = vld [vmem:[#allocation8 + $0x450] sm:$0xff]  ;;  %v1267_v42 = vld [vmem:[#allocation8 + $0x218] sm:$0xff] }
 0x180   : > { %v2862_v51 = vmul.f32 %v1194_v45, %v1026_v43  ;;  %v1170_v52 = vadd.f32 0.112945676, %v1169_v46  ;;  %1661 = vmatmul.f32.vlgmr.msra.gmra.mxu1 %v2824_v12  ;;  %v1159_v63 = vadd.f32 0.05243302, %v1158_v17  ;;  %v1330_v45 = vld [vmem:[#allocation8 + $0x410] sm:$0xff]  ;;  %v1027_v46 = vmul.f32 0.5, %v2837_v54 }
 0x181   : > { %1725 = vmatpush.msrb.mxu1 %v1327_v48  ;;  %v1446_v54 = vld [vmem:[#allocation8 + $0x7b0] sm:$0xff]  ;;  %v1379_v17 = vld [vmem:[#allocation8 + $0x598] sm:$0xff] }
 0x182   : > { %v1171_v58 = vmul.f32 %v1170_v52, %v2849_v47  ;;  %1521 = vmatmul.f32.vlgmr.msra.gmra.mxu2 %v2862_v51  ;;  %v1160_v11 = vmul.f32 %v1159_v63, %v2849_v47  ;;  %v1454_v52 = vld [vmem:[#allocation8 + $0x7f0] sm:$0xff]  ;;  %v1375_v57 = vld [vmem:[#allocation8 + $0x578] sm:$0xff] }
 0x183   : > { %1665 = vmatpush.msra.mxu2 %v1390_v53  ;;  %1726 = vmatpush.msrb.mxu1 %v1323_v55  ;;  %v1387_v53 = vld [vmem:[#allocation8 + $0x5d8] sm:$0xff]  ;;  %v1450_v55 = vld [vmem:[#allocation8 + $0x7d0] sm:$0xff] }
 0x184   : > { %v1172_v50 = vadd.f32 0.4994258, %v1171_v58  ;;  %v1161_v16 = vadd.f32 0.18741608, %v1160_v11  ;;  %v1438_v58 = vld [vmem:[#allocation8 + $0x770] sm:$0xff]  ;;  %v1347_v11 = vld [vmem:[#allocation8 + $0x498] sm:$0xff] }
 0x185   : > { %1666 = vmatpush.msra.mxu2 %v1386_v29  ;;  %1727 = vmatpush.msrb.mxu1 %v1319_v59  ;;  %v1371_v29 = vld [vmem:[#allocation8 + $0x558] sm:$0xff]  ;;  %v1434_v59 = vld [vmem:[#allocation8 + $0x750] sm:$0xff] }
 0x186   : > { %v1173_v3 = vmul.f32 %v1172_v50, %v2849_v47  ;;  %v1162_v44 = vmul.f32 %v1161_v16, %v2849_v47  ;;  %v1367_v50 = vld [vmem:[#allocation8 + $0x538] sm:$0xff]  ;;  %v1426_v63 = vld [vmem:[#allocation8 + $0x710] sm:$0xff] }
 0x187   : > { %1667 = vmatpush.msra.mxu2 %v1382_v60  ;;  %1728 = vmatpush.msrb.mxu1 %v1315_v61  ;;  %v1430_v60 = vld [vmem:[#allocation8 + $0x730] sm:$0xff]  ;;  %v1363_v61 = vld [vmem:[#allocation8 + $0x518] sm:$0xff] }
 0x188   : > { %v1174_v7 = vadd.f32 1.0, %v1173_v3  ;;  %v1163_v27 = vadd.f32 1.1283791, %v1162_v44  ;;  %v1359_v3 = vld [vmem:[#allocation8 + $0x4f8] sm:$0xff]  ;;  %v1402_v16 = vld [vmem:[#allocation8 + $0x650] sm:$0xff] }
 0x189   : > { %1668 = vmatpush.msra.mxu2 %v1378_v5  ;;  %1729 = vmatpush.msrb.mxu1 %v1311_v6  ;;  %v1422_v5 = vld [vmem:[#allocation8 + $0x6f0] sm:$0xff]  ;;  %v1355_v6 = vld [vmem:[#allocation8 + $0x4d8] sm:$0xff] }
 0x18a   : > { %2245 = vrcp.f32 %v1174_v7  ;;  %1601 = vmatmul.f32.vlgmr.msrb.gmra.mxu2 %v2862_v51  ;;  %v1186_v4 = vand.u32 2147483648, %v1174_v7  ;;  %v1184_v30 = vand.u32 2147483647, %v1174_v7  ;;  %vm1180_vm13 = vweird.f32 %v1174_v7  ;;  %v1451_v44 = vld [vmem:[#allocation8 + $0x7d8] sm:$0xff] }
 0x18b   : > { %1669 = vmatpush.msra.mxu2 %v1374_v9  ;;  %1730 = vmatpush.msrb.mxu1 %v1307_v10  ;;  %v1164_v41 = vmul.f32 %v1163_v27, %v2842_v0  ;;  %v1391_v0 = vld [vmem:[#allocation8 + $0x5f8] sm:$0xff]  ;;  %v1414_v10 = vld [vmem:[#allocation8 + $0x6b0] sm:$0xff] }
 0x18c   : > { %v1187_v32 = vor.u32 1.1754944e-38, %v1186_v4  ;;  %vm1185_vm15 = vcmp.eq.f32.partialorder %v1184_v30, 8.507059e+37  ;;  %v1351_v9 = vld [vmem:[#allocation8 + $0x4b8] sm:$0xff] }
 0x18d   : > { %1670 = vmatpush.msra.mxu2 %v1370_v34  ;;  %1731 = vmatpush.msrb.mxu1 %v1303_v13  ;;  %v1410_v34 = vld [vmem:[#allocation8 + $0x690] sm:$0xff]  ;;  %v1343_v13 = vld [vmem:[#allocation8 + $0x478] sm:$0xff] }
 0x18e   : > { %v1431_v4 = vld [vmem:[#allocation8 + $0x738] sm:$0xff] }
 0x18f   : > { %1671 = vmatpush.msra.mxu2 %v1366_v14  ;;  %1732 = vmatpush.msrb.mxu1 %v1299_v15  ;;  %v1406_v14 = vld [vmem:[#allocation8 + $0x670] sm:$0xff]  ;;  %v1339_v15 = vld [vmem:[#allocation8 + $0x458] sm:$0xff] }
 0x190   : > { %v2246_v20 = vpop.eup %2245  ;;  %v1419_v27 = vld [vmem:[#allocation8 + $0x6d8] sm:$0xff] }
 0x191   : > { %v1176_v1 = vmul.f32 %v2246_v20, %v1174_v7  ;;  %1672 = vmatpush.msra.mxu2 %v1362_v18  ;;  %1733 = vmatpush.msrb.mxu1 %v1295_v19  ;;  %vm1181_vm12 = vweird.f32 %v2246_v20  ;;  %v1418_v7 = vld [vmem:[#allocation8 + $0x6d0] sm:$0xff]  ;;  %v1335_v18 = vld [vmem:[#allocation8 + $0x438] sm:$0xff] }
 0x192   : > { %vm1182_vm14 = vmor %vm1180_vm13, %vm1181_vm12  ;;  %v1398_v19 = vld [vmem:[#allocation8 + $0x630] sm:$0xff]  ;;  %v1407_v30 = vld [vmem:[#allocation8 + $0x678] sm:$0xff] }
 0x193   : > { %v1177_v8 = vsub.f32 1.0, %v1176_v1  ;;  %1673 = vmatpush.msra.mxu2 %v1358_v62  ;;  %1734 = vmatpush.msrb.mxu1 %v1291_v21  ;;  %v1394_v62 = vld [vmem:[#allocation8 + $0x610] sm:$0xff]  ;;  %v1455_v21 = vld [vmem:[#allocation8 + $0x7f8] sm:$0xff] }
 0x194   : > { %v1447_v1 = vld [vmem:[#allocation8 + $0x7b8] sm:$0xff] }
 0x195   : > { %v1178_v28 = vmul.f32 %v2246_v20, %v1177_v8  ;;  %1674 = vmatpush.msra.mxu2 %v1354_v2  ;;  %1735 = vmatpush.msrb.mxu1 %v1287_v24  ;;  %v1443_v2 = vld [vmem:[#allocation8 + $0x798] sm:$0xff] }
 0x196   : > { %v1439_v24 = vld [vmem:[#allocation8 + $0x778] sm:$0xff] }
 0x197   : > { %v1179_v47 = vadd.f32 %v2246_v20, %v1178_v28  ;;  %1675 = vmatpush.msra.mxu2 %v1350_v25  ;;  %1736 = vmatpush.msrb.mxu1 %v1283_v26  ;;  %v1435_v8 = vld [vmem:[#allocation8 + $0x758] sm:$0xff] }
 0x198   : > { %v1427_v25 = vld [vmem:[#allocation8 + $0x718] sm:$0xff] }
 0x199   : > { %v1183_v35 = vsel %vm1182_vm14, %v2246_v20, %v1179_v47  ;;  %1676 = vmatpush.msra.mxu2 %v1346_v31  ;;  %1737 = vmatpush.msrb.mxu1 %v1279_v23  ;;  %v1331_v20 = vld [vmem:[#allocation8 + $0x418] sm:$0xff] }
 0x19a   : > { %v1188_v36 = vsel %vm1185_vm15, %v1187_v32, %v1183_v35  ;;  %v1423_v26 = vld [vmem:[#allocation8 + $0x6f8] sm:$0xff] }
 0x19b   : > { %v1189_v39 = vmul.f32 %v1188_v36, %v1164_v41  ;;  %1677 = vmatpush.msra.mxu2 %v1342_v22  ;;  %1738 = vmatpush.msrb.mxu1 %v1275_v33  ;;  %v1411_v28 = vld [vmem:[#allocation8 + $0x698] sm:$0xff]  ;;  %v1802_v33 = vld [vmem:[#allocation11 + $0x68] sm:$0xff]  ;;  %v1801_v41 = vld [vmem:[#allocation11 + $0x60] sm:$0xff] }
 0x19c   : > { %v1403_v31 = vld [vmem:[#allocation8 + $0x658] sm:$0xff] }
 0x19d   : > { %v2128_v43 = vclamps-f32 %v1189_v39, 1.0  ;;  %1678 = vmatpush.msra.mxu2 %v1338_v37  ;;  %1739 = vmatpush.msrb.mxu1 %v1271_v38  ;;  %v1399_v23 = vld [vmem:[#allocation8 + $0x638] sm:$0xff]  ;;  %v1818_v38 = vld [vmem:[#allocation11 + $0xe8] sm:$0xff] }
 0x19e   : > { %v1395_v47 = vld [vmem:[#allocation8 + $0x618] sm:$0xff] }
 0x19f   : > { %v1195_v48 = vadd.f32 1.0, %v2128_v43  ;;  %1679 = vmatpush.msra.mxu2 %v1334_v40  ;;  %1740 = vmatpush.msrb.mxu1 %v1267_v42  ;;  %v1804_v32 = vld [vmem:[#allocation11 + $0x78] sm:$0xff]  ;;  %v1803_v22 = vld [vmem:[#allocation11 + $0x70] sm:$0xff]  ;;  %v1817_v40 = vld [vmem:[#allocation11 + $0xe0] sm:$0xff] }
 0x1a0   : > { %1741 = vmatmul.f32.vlgmr.msrb.gmra.mxu1 %v2824_v12  ;;  %v1442_v12 = vld [vmem:[#allocation8 + $0x790] sm:$0xff]  ;;  %1856 = vmatpush.msra.mxu0 %v1804_v32  ;;  %v1820_v35 = vld [vmem:[#allocation11 + $0xf8] sm:$0xff] }
 0x1a1   : > { %v2875_v49 = vmul.f32 %v1195_v48, %v1027_v46  ;;  %1680 = vmatpush.msra.mxu2 %v1330_v45  ;;  %v1819_v36 = vld [vmem:[#allocation11 + $0xf0] sm:$0xff]  ;;  %v1800_v37 = vld [vmem:[#allocation11 + $0x58] sm:$0xff]  ;;  %1876 = vmatpush.msra.mxu1 %v1820_v35  ;;  %v1798_v42 = vld [vmem:[#allocation11 + $0x48] sm:$0xff] }
 0x1a2   : > { %1681 = vmatmul.f32.vlgmr.msra.gmra.mxu2 %v2862_v51  ;;  %1857 = vmatpush.msra.mxu0 %v1803_v22  ;;  %v1799_v39 = vld [vmem:[#allocation11 + $0x50] sm:$0xff]  ;;  %v1816_v43 = vld [vmem:[#allocation11 + $0xd8] sm:$0xff]  ;;  %v1797_v45 = vld [vmem:[#allocation11 + $0x40] sm:$0xff] }
 0x1a3   : > { %1541 = vmatmul.f32.vlgmr.msra.gmra.mxu3 %v2875_v49  ;;  %1745 = vmatpush.msrb.mxu2 %v1391_v0  ;;  %v1815_v46 = vld [vmem:[#allocation11 + $0xd0] sm:$0xff]  ;;  %v1796_v48 = vld [vmem:[#allocation11 + $0x38] sm:$0xff]  ;;  %v1850_v35 = vld [vmem:[#allocation11 + $0x1e8] sm:$0xff] }
 0x1a4   : > { %1685 = vmatpush.msra.mxu3 %v1454_v52  ;;  %1858 = vmatpush.msra.mxu0 %v1802_v33  ;;  %v1795_v0 = vld [vmem:[#allocation11 + $0x30] sm:$0xff]  ;;  %v1814_v52 = vld [vmem:[#allocation11 + $0xc8] sm:$0xff]  ;;  %v1852_v22 = vld [vmem:[#allocation11 + $0x1f8] sm:$0xff] }
 0x1a5   : > { %1746 = vmatpush.msrb.mxu2 %v1387_v53  ;;  %1877 = vmatpush.msra.mxu1 %v1819_v36  ;;  %v1793_v53 = vld [vmem:[#allocation11 + $0x20] sm:$0xff]  ;;  %v1851_v33 = vld [vmem:[#allocation11 + $0x1f0] sm:$0xff] }
 0x1a6   : > { %1686 = vmatpush.msra.mxu3 %v1450_v55  ;;  %1859 = vmatpush.msra.mxu0 %v1801_v41  ;;  %v1813_v55 = vld [vmem:[#allocation11 + $0xc0] sm:$0xff] }
 0x1a7   : > { %1747 = vmatpush.msrb.mxu2 %v1383_v56  ;;  %1878 = vmatpush.msra.mxu1 %v1818_v38  ;;  %v1792_v56 = vld [vmem:[#allocation11 + $0x18] sm:$0xff]  ;;  %v1849_v38 = vld [vmem:[#allocation11 + $0x1e0] sm:$0xff] }
 0x1a8   : > { %1687 = vmatpush.msra.mxu3 %v1446_v54  ;;  %1860 = vmatpush.msra.mxu0 %v1800_v37  ;;  %v1812_v54 = vld [vmem:[#allocation11 + $0xb8] sm:$0xff] }
 0x1a9   : > { %1748 = vmatpush.msrb.mxu2 %v1379_v17  ;;  %1879 = vmatpush.msra.mxu1 %v1817_v40  ;;  %v1791_v17 = vld [vmem:[#allocation11 + $0x10] sm:$0xff]  ;;  %v1848_v40 = vld [vmem:[#allocation11 + $0x1d8] sm:$0xff] }
 0x1aa   : > { %1688 = vmatpush.msra.mxu3 %v1442_v12  ;;  %1861 = vmatpush.msra.mxu0 %v1799_v39  ;;  %v1811_v12 = vld [vmem:[#allocation11 + $0xb0] sm:$0xff] }
 0x1ab   : > { %1621 = vmatmul.f32.vlgmr.msrb.gmra.mxu3 %v2875_v49  ;;  %1749 = vmatpush.msrb.mxu2 %v1375_v57  ;;  %v1790_v57 = vld [vmem:[#allocation11 + $0x8] sm:$0xff] }
 0x1ac   : > { %1689 = vmatpush.msra.mxu3 %v1438_v58  ;;  %1862 = vmatpush.msra.mxu0 %v1798_v42  ;;  %v1810_v58 = vld [vmem:[#allocation11 + $0xa8] sm:$0xff]  ;;  %v1847_v42 = vld [vmem:[#allocation11 + $0x1d0] sm:$0xff] }
 0x1ad   : > { %1750 = vmatpush.msrb.mxu2 %v1371_v29  ;;  %1880 = vmatpush.msra.mxu1 %v1816_v43  ;;  %v1789_v29 = vld [vmem:[#allocation11] sm:$0xff]  ;;  %v1846_v43 = vld [vmem:[#allocation11 + $0x1c8] sm:$0xff] }
 0x1ae   : > { %1690 = vmatpush.msra.mxu3 %v1434_v59  ;;  %1863 = vmatpush.msra.mxu0 %v1797_v45  ;;  %v1809_v59 = vld [vmem:[#allocation11 + $0xa0] sm:$0xff] }
 0x1af   : > { %1751 = vmatpush.msrb.mxu2 %v1367_v50  ;;  %1881 = vmatpush.msra.mxu1 %v1815_v46  ;;  %v1836_v50 = vld [vmem:[#allocation11 + $0x178] sm:$0xff]  ;;  %v1845_v45 = vld [vmem:[#allocation11 + $0x1c0] sm:$0xff] }
 0x1b0   : > { %1691 = vmatpush.msra.mxu3 %v1430_v60  ;;  %1864 = vmatpush.msra.mxu0 %v1796_v48  ;;  %v1808_v60 = vld [vmem:[#allocation11 + $0x98] sm:$0xff]  ;;  %v1843_v48 = vld [vmem:[#allocation11 + $0x1b0] sm:$0xff] }
 0x1b1   : > { %1752 = vmatpush.msrb.mxu2 %v1363_v61  ;;  %1882 = vmatpush.msra.mxu1 %v1814_v52  ;;  %v1835_v61 = vld [vmem:[#allocation11 + $0x170] sm:$0xff]  ;;  %v1844_v46 = vld [vmem:[#allocation11 + $0x1b8] sm:$0xff] }
 0x1b2   : > { %1692 = vmatpush.msra.mxu3 %v1426_v63  ;;  %1865 = vmatpush.msra.mxu0 %v1795_v0  ;;  %v1807_v63 = vld [vmem:[#allocation11 + $0x90] sm:$0xff] }
 0x1b3   : > { %1753 = vmatpush.msrb.mxu2 %v1359_v3  ;;  %1883 = vmatpush.msra.mxu1 %v1813_v55  ;;  %v1834_v3 = vld [vmem:[#allocation11 + $0x168] sm:$0xff] }
 0x1b4   : > { %1693 = vmatpush.msra.mxu3 %v1422_v5  ;;  %v1806_v5 = vld [vmem:[#allocation11 + $0x88] sm:$0xff] }
 0x1b5   : > { %1754 = vmatpush.msrb.mxu2 %v1355_v6  ;;  %1884 = vmatpush.msra.mxu1 %v1812_v54  ;;  %v1833_v6 = vld [vmem:[#allocation11 + $0x160] sm:$0xff]  ;;  %v1840_v54 = vld [vmem:[#allocation11 + $0x198] sm:$0xff] }
 0x1b6   : > { %1694 = vmatpush.msra.mxu3 %v1418_v7  ;;  %v1805_v7 = vld [vmem:[#allocation11 + $0x80] sm:$0xff] }
 0x1b7   : > { %1755 = vmatpush.msrb.mxu2 %v1351_v9  ;;  %1885 = vmatpush.msra.mxu1 %v1811_v12  ;;  %v1832_v9 = vld [vmem:[#allocation11 + $0x158] sm:$0xff] }
 0x1b8   : > { %1695 = vmatpush.msra.mxu3 %v1414_v10  ;;  %v1831_v10 = vld [vmem:[#allocation11 + $0x150] sm:$0xff] }
 0x1b9   : > { %1756 = vmatpush.msrb.mxu2 %v1347_v11  ;;  %1886 = vmatpush.msra.mxu1 %v1810_v58  ;;  %v1830_v11 = vld [vmem:[#allocation11 + $0x148] sm:$0xff]  ;;  %v1839_v58 = vld [vmem:[#allocation11 + $0x190] sm:$0xff] }
 0x1ba   : > { %1696 = vmatpush.msra.mxu3 %v1410_v34  ;;  %v1829_v34 = vld [vmem:[#allocation11 + $0x140] sm:$0xff] }
 0x1bb   : > { %1757 = vmatpush.msrb.mxu2 %v1343_v13  ;;  %1887 = vmatpush.msra.mxu1 %v1809_v59  ;;  %v2883_v13 = vld [vmem:[#allocation10] sm:$0xf] }
 0x1bc   : > { %1697 = vmatpush.msra.mxu3 %v1406_v14  ;;  %v1828_v14 = vld [vmem:[#allocation11 + $0x138] sm:$0xff]  ;;  %v1459_v0 = vperm.slane %v2883_v13, 2 }
 0x1bd   : > { %1758 = vmatpush.msrb.mxu2 %v1339_v15  ;;  %1888 = vmatpush.msra.mxu1 %v1808_v60  ;;  %v1482_v15 = vpop.f32.mrf.mxu0 }
 0x1be   : > { %1698 = vmatpush.msra.mxu3 %v1402_v16  ;;  %v1827_v16 = vld [vmem:[#allocation11 + $0x130] sm:$0xff] }
 0x1bf   : > { %1759 = vmatpush.msrb.mxu2 %v1335_v18  ;;  %1889 = vmatpush.msra.mxu1 %v1807_v63  ;;  %v1457_v18 = vperm.slane %v2883_v13, 0  ;;  %v1460_v63 = vperm.slane %v2883_v13, 3 }
 0x1c0   : > { %1699 = vmatpush.msra.mxu3 %v1398_v19 }
 0x1c1   : > { %1760 = vmatpush.msrb.mxu2 %v1331_v20  ;;  %1890 = vmatpush.msra.mxu1 %v1806_v5  ;;  %v1826_v20 = vld [vmem:[#allocation11 + $0x128] sm:$0xff] }
 0x1c2   : > { %1700 = vmatpush.msra.mxu3 %v1394_v62  ;;  %1761 = vmatmul.f32.vlgmr.msrb.gmra.mxu2 %v2862_v51  ;;  %v1415_v51 = vld [vmem:[#allocation8 + $0x6b8] sm:$0xff] }
 0x1c3   : > { %1701 = vmatmul.f32.vlgmr.msra.gmra.mxu3 %v2875_v49  ;;  %1896 = vmatpush.msra.mxu2 %v1836_v50  ;;  %v1838_v50 = vld [vmem:[#allocation11 + $0x188] sm:$0xff] }
 0x1c4   : > { %1765 = vmatpush.msrb.mxu3 %v1455_v21  ;;  %1891 = vmatpush.msra.mxu1 %v1805_v7  ;;  %v1825_v21 = vld [vmem:[#allocation11 + $0x120] sm:$0xff] }
 0x1c5   : > { %1897 = vmatpush.msra.mxu2 %v1835_v61  ;;  %v1837_v61 = vld [vmem:[#allocation11 + $0x180] sm:$0xff] }
 0x1c6   : > { %1766 = vmatpush.msrb.mxu3 %v1451_v44  ;;  %v1483_v44 = vadd.f32 %v1482_v15, %v1457_v18  ;;  %v2236_v15 = vld [vmem:[%s2938_s6] ss:$0 sm:$0xff] }
 0x1c7   : > { %1898 = vmatpush.msra.mxu2 %v1834_v3 }
 0x1c8   : > { %1767 = vmatpush.msrb.mxu3 %v1447_v1  ;;  %v1824_v1 = vld [vmem:[#allocation11 + $0x118] sm:$0xff] }
 0x1c9   : > { %1899 = vmatpush.msra.mxu2 %v1833_v6 }
 0x1ca   : > { %1768 = vmatpush.msrb.mxu3 %v1443_v2 }
 0x1cb   : > { %1900 = vmatpush.msra.mxu2 %v1832_v9 }
 0x1cc   : > { %1769 = vmatpush.msrb.mxu3 %v1439_v24  ;;  %v1458_v24 = vperm.slane %v2883_v13, 1 }
 0x1cd   : > { %1901 = vmatpush.msra.mxu2 %v1831_v10 }
 0x1ce   : > { %1770 = vmatpush.msrb.mxu3 %v1435_v8 }
 0x1cf   : > { %1902 = vmatpush.msra.mxu2 %v1830_v11 }
 0x1d0   : > { %1771 = vmatpush.msrb.mxu3 %v1431_v4  ;;  %v1562_v4 = vpop.f32.mrf.mxu0 }
 0x1d1   : > { %1903 = vmatpush.msra.mxu2 %v1829_v34 }
 0x1d2   : > { %1772 = vmatpush.msrb.mxu3 %v1427_v25 }
 0x1d3   : > { %1904 = vmatpush.msra.mxu2 %v1828_v14 }
 0x1d4   : > { %1773 = vmatpush.msrb.mxu3 %v1423_v26  ;;  %v1823_v26 = vld [vmem:[#allocation11 + $0x110] sm:$0xff] }
 0x1d5   : > { %1905 = vmatpush.msra.mxu2 %v1827_v16 }
 0x1d6   : > { %1774 = vmatpush.msrb.mxu3 %v1419_v27 }
 0x1d7   : > { %1906 = vmatpush.msra.mxu2 %v1826_v20 }
 0x1d8   : > { %1775 = vmatpush.msrb.mxu3 %v1415_v51 }
 0x1d9   : > { %1907 = vmatpush.msra.mxu2 %v1825_v21 }
 0x1da   : > { %1776 = vmatpush.msrb.mxu3 %v1411_v28  ;;  %v1822_v28 = vld [vmem:[#allocation11 + $0x108] sm:$0xff] }
 0x1db   : > { %1908 = vmatpush.msra.mxu2 %v1824_v1  ;;  %v1642_v52 = vpop.f32.mrf.mxu0  ;;  %v2520_v1 = vmov 128.0  }
 0x1dc   : > { %1777 = vmatpush.msrb.mxu3 %v1407_v30  ;;  %v1563_v30 = vadd.f32 %v1562_v4, %v1458_v24  ;;  %2247 = vrcp.f32 %v2520_v1 }
 0x1dd   : > { %v1502_v19 = vpop.f32.mrf.mxu1  ;;  %1909 = vmatpush.msra.mxu2 %v1823_v26 }
 0x1de   : > { %1778 = vmatpush.msrb.mxu3 %v1403_v31  ;;  %v1503_v2 = vadd.f32 %v1502_v19, %v1483_v44 }
 0x1df   : > { %1910 = vmatpush.msra.mxu2 %v1822_v28 }
 0x1e0   : > { %1779 = vmatpush.msrb.mxu3 %v1399_v23  ;;  %v1821_v23 = vld [vmem:[#allocation11 + $0x100] sm:$0xff] }
 0x1e1   : > { %1911 = vmatpush.msra.mxu2 %v1821_v23 }
 0x1e2   : > { %1780 = vmatpush.msrb.mxu3 %v1395_v47 }
 0x1e3   : > { %1781 = vmatmul.f32.vlgmr.msrb.gmra.mxu3 %v2875_v49  ;;  %v1794_v49 = vld [vmem:[#allocation11 + $0x28] sm:$0xff] }
 0x1e4   : > { %1866 = vmatpush.msra.mxu0 %v1794_v49  ;;  %1916 = vmatpush.msra.mxu3 %v1852_v22  ;;  %v1842_v49 = vld [vmem:[#allocation11 + $0x1a8] sm:$0xff] }
 0x1e5   : > { %v1582_v51 = vpop.f32.mrf.mxu1 }
 0x1e6   : > { %1867 = vmatpush.msra.mxu0 %v1793_v53  ;;  %v1583_v32 = vadd.f32 %v1582_v51, %v1563_v30  ;;  %1917 = vmatpush.msra.mxu3 %v1851_v33  ;;  %v1841_v53 = vld [vmem:[#allocation11 + $0x1a0] sm:$0xff] }
 0x1e8   : > { %1868 = vmatpush.msra.mxu0 %v1792_v56  ;;  %1918 = vmatpush.msra.mxu3 %v1850_v35  ;;  %v1643_v56 = vadd.f32 %v1642_v52, %v1459_v0 }
 0x1ea   : > { %1869 = vmatpush.msra.mxu0 %v1791_v17  ;;  %1919 = vmatpush.msra.mxu3 %v1849_v38 }
 0x1ec   : > { %1870 = vmatpush.msra.mxu0 %v1790_v57  ;;  %1920 = vmatpush.msra.mxu3 %v1848_v40  ;;  %v2238_v40 = vld [vmem:[%s2940_s8] ss:$0 sm:$0xff] }
 0x1ee   : > { %1871 = vmatpush.msra.mxu0 %v1789_v29  ;;  %1921 = vmatpush.msra.mxu3 %v1847_v42 }
 0x1f0   : > { %1922 = vmatpush.msra.mxu3 %v1846_v43 }
 0x1f2   : > { %1923 = vmatpush.msra.mxu3 %v1845_v45 }
 0x1f4   : > { %1924 = vmatpush.msra.mxu3 %v1844_v46 }
 0x1f6   : > { %1925 = vmatpush.msra.mxu3 %v1843_v48 }
 0x1f8   : > { %1926 = vmatpush.msra.mxu3 %v1842_v49 }
 0x1fa   : > { %1927 = vmatpush.msra.mxu3 %v1841_v53 }
 0x1fb   : > { %v1722_v3 = vpop.f32.mrf.mxu0 }
 0x1fc   : > { %1928 = vmatpush.msra.mxu3 %v1840_v54  ;;  %v1723_v6 = vadd.f32 %v1722_v3, %v1460_v63 }
 0x1fd   : > { %v1662_v55 = vpop.f32.mrf.mxu1 }
 0x1fe   : > { %v1663_v12 = vadd.f32 %v1662_v55, %v1643_v56  ;;  %1929 = vmatpush.msra.mxu3 %v1839_v58 }
 0x200   : > { %1930 = vmatpush.msra.mxu3 %v1838_v50 }
 0x202   : > { %1931 = vmatpush.msra.mxu3 %v1837_v61 }
 0x205   : > { %v1522_v62 = vpop.f32.mrf.mxu2 }
 0x206   : > { %v1523_v8 = vadd.f32 %v1522_v62, %v1503_v2  ;;  %v2248_v2 = vpop.eup %2247 }
 0x207   : > { %v1939_v24 = vmul.f32 128.0, %v2248_v2  ;;  %vm1943_vm0 = vweird.f32 %v2248_v2 }
 0x20d   : > { %v1602_v47 = vpop.f32.mrf.mxu2 }
 0x20e   : > { %v1603_v41 = vadd.f32 %v1602_v47, %v1583_v32 }
 0x21d   : > { %v1742_v5 = vpop.f32.mrf.mxu1 }
 0x21e   : > { %v1743_v9 = vadd.f32 %v1742_v5, %v1723_v6 }
 0x225   : > { %v1682_v17 = vpop.f32.mrf.mxu2 }
 0x226   : > { %v1542_v25 = vpop.f32.mrf.mxu3  ;;  %v1683_v57 = vadd.f32 %v1682_v17, %v1663_v12 }
 0x227   : > { %v1543_v27 = vadd.f32 %v1542_v25, %v1523_v8  ;;  %v1940_v8 = vsub.f32 1.0, %v1939_v24 }
 0x229   : > { %v1785_v31 = vmax.f32 %v1543_v27, 0.0  ;;  %v1941_v4 = vmul.f32 %v2248_v2, %v1940_v8 }
 0x22b   : > { %1872 = vmatmul.f32.vlgmr.msra.gmra.mxu0 %v1785_v31  ;;  %v1942_v25 = vadd.f32 %v2248_v2, %v1941_v4 }
 0x22d   : > { %v1944_v26 = vsel %vm1943_vm0, %v2248_v2, %v1942_v25 }
 0x22e   : > { %v1622_v36 = vpop.f32.mrf.mxu3 }
 0x22f   : > { %v1623_v37 = vadd.f32 %v1622_v36, %v1603_v41 }
 0x231   : > { %v1786_v39 = vmax.f32 %v1623_v37, 0.0  ;;  %v2237_v37 = vld [vmem:[%s2939_s7] ss:$0 sm:$0xff] }
 0x233   : > { %1892 = vmatmul.f32.vlgmr.msra.gmra.mxu1 %v1786_v39 }
 0x245   : > { %v1762_v7 = vpop.f32.mrf.mxu2 }
 0x246   : > { %v1702_v29 = vpop.f32.mrf.mxu3  ;;  %v1763_v10 = vadd.f32 %v1762_v7, %v1743_v9 }
 0x247   : > { %v1703_v59 = vadd.f32 %v1702_v29, %v1683_v57 }
 0x249   : > { %v1787_v60 = vmax.f32 %v1703_v59, 0.0 }
 0x24b   : > { %1912 = vmatmul.f32.vlgmr.msra.gmra.mxu2 %v1787_v60 }
 0x266   : > { %v1782_v11 = vpop.f32.mrf.mxu3 }
 0x267   : > { %v1783_v34 = vadd.f32 %v1782_v11, %v1763_v10 }
 0x269   : > { %v1788_v14 = vmax.f32 %v1783_v34, 0.0 }
 0x26b   : > { %1932 = vmatmul.f32.vlgmr.msra.gmra.mxu3 %v1788_v14 }
 0x2a8   : > { %v1873_v16 = vpop.f32.mrf.mxu0 }
 0x2a9   : > { %v1874_v19 = vadd.f32 %v2236_v15, %v1873_v16 }
 0x2b0   : > { %v1893_v18 = vpop.f32.mrf.mxu1 }
 0x2b1   : > { %v1894_v62 = vadd.f32 %v1893_v18, %v1874_v19 }
 0x2ce   : > { %v1913_v20 = vpop.f32.mrf.mxu2 }
 0x2cf   : > { %v1914_v13 = vadd.f32 %v1913_v20, %v1894_v62 }
 0x2ee   : > { %v1933_v21 = vpop.f32.mrf.mxu3 }
 0x2ef   : > { %v1934_v44 = vadd.f32 %v1933_v21, %v1914_v13 }
 0x2f1   : > { %1936 = vadd.xlane.f32.xlu0 %v1934_v44 }
 0x364   : > { %v1937_v27 = vpop.xlane.xlu0 %1936 }
 0x365   : > { %v1945_v51 = vmul.f32 %v1944_v26, %v1937_v27 }
 0x367   : > { %v1946_v28 = vsub.f32 %v1934_v44, %v1945_v51 }
 0x369   : > { %v1947_v30 = vmul.f32 %v1946_v28, %v1946_v28 }
 0x36b   : > { %1948 = vadd.xlane.f32.xlu0 %v1947_v30 }
 0x3de   : > { %v1949_v31 = vpop.xlane.xlu0 %1948 }
 0x3df   : > { %v1950_v23 = vmul.f32 %v1949_v31, %v1944_v26 }
 0x3e1   : > { %v1951_v47 = vadd.f32 1e-05, %v1950_v23 }
 0x3e3   : > { %2249 = vrsqrt.f32 %v1951_v47  ;;  %vm1958_vm2 = vweird.f32 %v1951_v47 }
 0x3e9   : > { %v2250_v32 = vpop.eup %2249 }
 0x3ea   : > { %v1953_v22 = vmul.f32 %v2250_v32, %v1951_v47  ;;  %vm1959_vm1 = vweird.f32 %v2250_v32 }
 0x3eb   : > { %vm1960_vm3 = vmor %vm1958_vm2, %vm1959_vm1 }
 0x3ec   : > { %v1954_v33 = vmul.f32 %v2250_v32, %v1953_v22 }
 0x3ee   : > { %v1955_v41 = vmul.f32 0.5, %v1954_v33 }
 0x3f0   : > { %v1956_v35 = vsub.f32 1.5, %v1955_v41 }
 0x3f2   : > { %v1957_v36 = vmul.f32 %v2250_v32, %v1956_v35 }
 0x3f4   : > { %v1961_v38 = vsel %vm1960_vm3, %v2250_v32, %v1957_v36 }
 0x3f5   : > { %v1962_v39 = vmul.f32 %v1961_v38, %v1946_v28 }
 0x3f7   : > { %v1966_v42 = vmul.f32 %v2237_v37, %v1962_v39 }
 0x3f9   : > { %v1970_v43 = vadd.f32 %v2238_v40, %v1966_v42 }
 0x3fb   : > { %1971 = vst [vmem:[%s429_s16] sm:$0xff] %v1970_v43 }
 0x3fc   : > { %2458 = shalt.err (!%p2455_p9)
}
 0x3fd   : > { %2156 = dma.vmem_to_hbm [thread:$0]  (%p2657_p13), %s1986_s28, 128, %s1988_s24, %s1973_s25  }
 0x3fe PF: > { %s1999_s15 = sand.u32 1, %s2497_s30   ;;  %p2958_p10 = scmp.ge.s32.totalorder %s2509_s12, 2 }
 0x3ff   : > { %s2000_s18 = scalar_lea.sflag [#allocation4], %s1999_s15 }
 0x400   : > { %p2179_p11 = pnand %p2958_p10, %p2662_p4 }
 0x402   : > { %p2180_p0 = pneg %p2179_p11 }
 0x404   : > { %2492 = dma.done.wait (%p2180_p0), %s2000_s18, 128  }
 0x405   : > { %2494 = vsyncadd (%p2180_p0), %s2000_s18, 4294967168  ;;  %p25_p2 = scmp.ge.s32.totalorder %s2637_s13, 4   ;;  %s2959_s30 = smov %s2501_s10 }
 0x406   : > { %s2960_s10 = smov %s2505_s11  ;;  %s2961_s11 = smov %s2649_s20 }
 0x407   : > { %s2962_s12 = smov %s2637_s13  ;;  %27 = sbr.rel (!%p25_p2) target bundleno = 12 (0xc), region = 121 }
 0x40c   :  { %2006 = vsyncpa [#allocation3], 1 }
 0x40d   :  { %2008 = vsyncpa [#allocation3 + $0x1], 1 }
 0x40e   :  { %2009 = vsyncpa [#allocation6], 1 }
 0x40f   :  { %2010 = vsyncpa [#allocation9], 1 }
 0x410   :  { %2011 = vsyncpa [#allocation12], 1 }
 0x411   :  { %2012 = vsyncpa [#allocation4], 1 }
 0x412   :  { %2014 = vsyncpa [#allocation4 + $0x1], 1 }

</bundles_post_ra>
